<compile_context>
chip_gen: v7x
topology: tpu7x:2x2x1
jax: 0.10.0
libtpu: 0.0.40
codegen_flags: <defaults>
</compile_context>

<pallas_src>
import functools

import jax
import jax.numpy as jnp
from jax.experimental import pallas as pl
from jax.experimental.pallas import tpu as pltpu


def mlp_kernel(x_ref, w1_ref, b1_ref, w2_ref, b2_ref, w3_ref, b3_ref, *rest,
               is_training):
    """Fused 3-layer residual MLP forward for one (TM, D) row tile."""
    if is_training:
        m1_ref, m2_ref, o_ref = rest
    else:
        (o_ref,) = rest

    x = x_ref[...]  # (TM, D) f32

    # H1 = relu(X @ W1 + b1) + X ; dropout1
    h1 = jnp.maximum(
        jnp.dot(x.astype(jnp.bfloat16), w1_ref[...],
                preferred_element_type=jnp.float32) + b1_ref[...],
        0.0) + x
    if is_training:
        h1 = h1 * m1_ref[...].astype(jnp.float32)

    # H2 = relu(H1 @ W2 + b2) + H1 + X ; dropout2
    h2 = jnp.maximum(
        jnp.dot(h1.astype(jnp.bfloat16), w2_ref[...],
                preferred_element_type=jnp.float32) + b2_ref[...],
        0.0) + h1 + x
    if is_training:
        h2 = h2 * m2_ref[...].astype(jnp.float32)

    # out = H2 @ W3 + b3   (W3/b3 zero-padded to a lane-dense 128-wide slab)
    out = jnp.dot(h2.astype(jnp.bfloat16), w3_ref[...],
                  preferred_element_type=jnp.float32) + b3_ref[...]
    o_ref[...] = out.astype(o_ref.dtype)


def _dropout_mask(key, p, shape):
    """Inverted-dropout scale mask: 0 with prob p, else 1/(1-p).  Stored bf16."""
    if p <= 0.0:
        return jnp.ones(shape, jnp.bfloat16)
    if p >= 1.0:
        return jnp.zeros(shape, jnp.bfloat16)
    keep = jax.random.bernoulli(key, 1.0 - p, shape)
    return (keep.astype(jnp.float32) * (1.0 / (1.0 - p))).astype(jnp.bfloat16)


def mlp_forward(x, params, *, is_training=True, p1=0.2, p2=0.5,
                dropout_key=None, tm=256):
    """x: (N, num_inputs) f32.  params: weights (in,out), biases (1,out)."""
    n, d = x.shape
    d_h1 = params["w1"].shape[1]
    d_h2 = params["w2"].shape[1]
    d_out = params["w3"].shape[1]
    assert d == d_h1 == d_h2, (
        "residual adds require num_inputs == num_hiddens1 == num_hiddens2")

    # Lane-dense output: pad the last layer to a multiple of 128 columns.
    d_out_pad = max(128, pl.cdiv(d_out, 128) * 128)

    bf16 = jnp.bfloat16
    w1 = params["w1"].astype(bf16)
    w2 = params["w2"].astype(bf16)
    w3 = jnp.zeros((d_h2, d_out_pad), bf16).at[:, :d_out].set(
        params["w3"].astype(bf16))
    b1 = params["b1"].astype(jnp.float32).reshape(1, d_h1)
    b2 = params["b2"].astype(jnp.float32).reshape(1, d_h2)
    b3 = jnp.zeros((1, d_out_pad), jnp.float32).at[:, :d_out].set(
        params["b3"].astype(jnp.float32).reshape(1, d_out))

    block_m = min(tm, n)
    grid = (pl.cdiv(n, block_m),)

    row_spec = lambda cols: pl.BlockSpec((block_m, cols), lambda i: (i, 0))
    const_spec = lambda rows, cols: pl.BlockSpec((rows, cols), lambda i: (0, 0))

    in_specs = [
        row_spec(d),                  # x
        const_spec(d, d_h1),          # w1  (VMEM-resident across grid steps)
        const_spec(1, d_h1),          # b1
        const_spec(d_h1, d_h2),       # w2
        const_spec(1, d_h2),          # b2
        const_spec(d_h2, d_out_pad),  # w3 (padded)
        const_spec(1, d_out_pad),     # b3 (padded)
    ]
    inputs = [x, w1, b1, w2, b2, w3, b3]

    if is_training:
        if dropout_key is None:
            dropout_key = jax.random.PRNGKey(0)
        k1, k2 = jax.random.split(dropout_key)
        m1 = _dropout_mask(k1, p1, (n, d_h1))
        m2 = _dropout_mask(k2, p2, (n, d_h2))
        in_specs += [row_spec(d_h1), row_spec(d_h2)]
        inputs += [m1, m2]

    flops = 2 * n * d * d_h1 + 2 * n * d_h1 * d_h2 + 2 * n * d_h2 * d_out_pad
    bytes_accessed = (x.size * 4 + n * d_out_pad * 4
                      + (w1.size + w2.size + w3.size) * 2
                      + (b1.size + b2.size + b3.size) * 4
                      + (2 * n * d * 2 if is_training else 0))

    out_padded = pl.pallas_call(
        functools.partial(mlp_kernel, is_training=is_training),
        grid=grid,
        in_specs=in_specs,
        out_specs=pl.BlockSpec((block_m, d_out_pad), lambda i: (i, 0)),
        out_shape=jax.ShapeDtypeStruct((n, d_out_pad), jnp.float32),
        compiler_params=pltpu.CompilerParams(
            dimension_semantics=("parallel",)),
        cost_estimate=pl.CostEstimate(
            flops=flops, transcendentals=0, bytes_accessed=bytes_accessed),
    )(*inputs)

    return out_padded[:, :d_out]


def init_params(key, num_inputs, num_hiddens1, num_hiddens2, num_outputs):
    """Uniform init ~ PyTorch nn.Linear default (U(-1/sqrt(fan_in), +))."""
    ks = jax.random.split(key, 6)

    def lin(kw, kb, fan_in, fan_out):
        bound = 1.0 / float(fan_in) ** 0.5
        w = jax.random.uniform(kw, (fan_in, fan_out), jnp.float32, -bound, bound)
        b = jax.random.uniform(kb, (1, fan_out), jnp.float32, -bound, bound)
        return w, b

    w1, b1 = lin(ks[0], ks[1], num_inputs, num_hiddens1)
    w2, b2 = lin(ks[2], ks[3], num_hiddens1, num_hiddens2)
    w3, b3 = lin(ks[4], ks[5], num_hiddens2, num_outputs)
    return {"w1": w1, "b1": b1, "w2": w2, "b2": b2, "w3": w3, "b3": b3}


def _reference_eval(x, params):
    """Pure-JAX f32 reference of the eval-mode forward pass."""
    h1 = jnp.maximum(x @ params["w1"] + params["b1"], 0.0) + x
    h2 = jnp.maximum(h1 @ params["w2"] + params["b2"], 0.0) + h1 + x
    return h2 @ params["w3"] + params["b3"]


if __name__ == "__main__":
    # Residual connections force num_inputs == num_hiddens1 == num_hiddens2.
    N = 512
    NUM_INPUTS = NUM_HIDDENS1 = NUM_HIDDENS2 = 128
    NUM_OUTPUTS = 1

    key = jax.random.PRNGKey(0)
    kx, kp, kd = jax.random.split(key, 3)
    x = jax.random.normal(kx, (N, NUM_INPUTS), dtype=jnp.float32)
    params = init_params(kp, NUM_INPUTS, NUM_HIDDENS1, NUM_HIDDENS2, NUM_OUTPUTS)

    # Training mode (dropout active, per-row masks); two grid steps at TM=256.
    out_train = mlp_forward(x, params, is_training=True, p1=0.2, p2=0.5,
                            dropout_key=kd, tm=256)
    # Eval mode (deterministic path).
    out_eval = mlp_forward(x, params, is_training=False, tm=256)

    jax.block_until_ready(out_train)
    jax.block_until_ready(out_eval)

    assert out_train.shape == (N, NUM_OUTPUTS)
    assert out_eval.shape == (N, NUM_OUTPUTS)
    assert bool(jnp.all(jnp.isfinite(out_train)))
    assert bool(jnp.all(jnp.isfinite(out_eval)))

    # Loose tolerance: kernel matmuls use bf16 operands with f32 accumulation.
    ref = _reference_eval(x, params)
    assert bool(jnp.allclose(out_eval, ref, rtol=5e-2, atol=1e-1)), (
        float(jnp.max(jnp.abs(out_eval - ref))))

    print("KERNEL_OK")
</pallas_src>

<mosaic_0001>
module attributes {stable_mosaic.version = 11 : i64} {
  func.func @mlp_kernel(%arg0: i32, %arg1: memref<256x128xf32, #tpu.memory_space<vmem>>, %arg2: memref<128x128xbf16, #tpu.memory_space<vmem>>, %arg3: memref<1x128xf32, #tpu.memory_space<vmem>>, %arg4: memref<128x128xbf16, #tpu.memory_space<vmem>>, %arg5: memref<1x128xf32, #tpu.memory_space<vmem>>, %arg6: memref<128x128xbf16, #tpu.memory_space<vmem>>, %arg7: memref<1x128xf32, #tpu.memory_space<vmem>>, %arg8: memref<256x128xbf16, #tpu.memory_space<vmem>>, %arg9: memref<256x128xbf16, #tpu.memory_space<vmem>>, %arg10: memref<256x128xf32, #tpu.memory_space<vmem>>) attributes {dimension_semantics = [#tpu.dimension_semantics<parallel>], iteration_bounds = array<i64: 2>, scalar_prefetch = 0 : i64, scratch_operands = 0 : i64, tpu.core_type = #tpu.core_type<tc>, window_params = [{transform_indices = @transform_0, window_bounds = array<i64: 256, 128>}, {pipeline_mode = #tpu.pipeline_mode<synchronous>, transform_indices = @transform_1, window_bounds = array<i64: 128, 128>}, {pipeline_mode = #tpu.pipeline_mode<synchronous>, transform_indices = @transform_2, window_bounds = array<i64: 1, 128>}, {pipeline_mode = #tpu.pipeline_mode<synchronous>, transform_indices = @transform_3, window_bounds = array<i64: 128, 128>}, {pipeline_mode = #tpu.pipeline_mode<synchronous>, transform_indices = @transform_4, window_bounds = array<i64: 1, 128>}, {pipeline_mode = #tpu.pipeline_mode<synchronous>, transform_indices = @transform_5, window_bounds = array<i64: 128, 128>}, {pipeline_mode = #tpu.pipeline_mode<synchronous>, transform_indices = @transform_6, window_bounds = array<i64: 1, 128>}, {transform_indices = @transform_7, window_bounds = array<i64: 256, 128>}, {transform_indices = @transform_8, window_bounds = array<i64: 256, 128>}, {transform_indices = @transform_9, window_bounds = array<i64: 256, 128>}]} {
    %c0 = arith.constant 0 : index
    %c0_0 = arith.constant 0 : index
    %0 = vector.load %arg1[%c0, %c0_0] : memref<256x128xf32, #tpu.memory_space<vmem>>, vector<256x128xf32>
    %1 = arith.truncf %0 : vector<256x128xf32> to vector<256x128xbf16>
    %c0_1 = arith.constant 0 : index
    %c0_2 = arith.constant 0 : index
    %2 = vector.load %arg2[%c0_1, %c0_2] : memref<128x128xbf16, #tpu.memory_space<vmem>>, vector<128x128xbf16>
    %cst = arith.constant dense<0.000000e+00> : vector<256x128xf32>
    %3 = tpu.matmul %1, %2, %cst {dimension_numbers = #tpu.dot_dimension_numbers<[1], [0], [0], [1], [0, 0, 1, 1], [], []>} : vector<256x128xbf16>, vector<128x128xbf16>, vector<256x128xf32> -> vector<256x128xf32>
    %c0_3 = arith.constant 0 : index
    %c0_4 = arith.constant 0 : index
    %4 = vector.load %arg3[%c0_3, %c0_4] : memref<1x128xf32, #tpu.memory_space<vmem>>, vector<1x128xf32>
    %5 = vector.broadcast %4 : vector<1x128xf32> to vector<256x128xf32>
    %6 = arith.addf %3, %5 : vector<256x128xf32>
    %cst_5 = arith.constant 0.000000e+00 : f32
    %7 = vector.broadcast %cst_5 : f32 to vector<256x128xf32>
    %8 = arith.maximumf %6, %7 : vector<256x128xf32>
    %9 = arith.addf %8, %0 : vector<256x128xf32>
    %c0_6 = arith.constant 0 : index
    %c0_7 = arith.constant 0 : index
    %10 = vector.load %arg8[%c0_6, %c0_7] : memref<256x128xbf16, #tpu.memory_space<vmem>>, vector<256x128xbf16>
    %11 = arith.extf %10 : vector<256x128xbf16> to vector<256x128xf32>
    %12 = arith.mulf %9, %11 : vector<256x128xf32>
    %13 = arith.truncf %12 : vector<256x128xf32> to vector<256x128xbf16>
    %c0_8 = arith.constant 0 : index
    %c0_9 = arith.constant 0 : index
    %14 = vector.load %arg4[%c0_8, %c0_9] : memref<128x128xbf16, #tpu.memory_space<vmem>>, vector<128x128xbf16>
    %cst_10 = arith.constant dense<0.000000e+00> : vector<256x128xf32>
    %15 = tpu.matmul %13, %14, %cst_10 {dimension_numbers = #tpu.dot_dimension_numbers<[1], [0], [0], [1], [0, 0, 1, 1], [], []>} : vector<256x128xbf16>, vector<128x128xbf16>, vector<256x128xf32> -> vector<256x128xf32>
    %c0_11 = arith.constant 0 : index
    %c0_12 = arith.constant 0 : index
    %16 = vector.load %arg5[%c0_11, %c0_12] : memref<1x128xf32, #tpu.memory_space<vmem>>, vector<1x128xf32>
    %17 = vector.broadcast %16 : vector<1x128xf32> to vector<256x128xf32>
    %18 = arith.addf %15, %17 : vector<256x128xf32>
    %cst_13 = arith.constant 0.000000e+00 : f32
    %19 = vector.broadcast %cst_13 : f32 to vector<256x128xf32>
    %20 = arith.maximumf %18, %19 : vector<256x128xf32>
    %21 = arith.addf %20, %12 : vector<256x128xf32>
    %22 = arith.addf %21, %0 : vector<256x128xf32>
    %c0_14 = arith.constant 0 : index
    %c0_15 = arith.constant 0 : index
    %23 = vector.load %arg9[%c0_14, %c0_15] : memref<256x128xbf16, #tpu.memory_space<vmem>>, vector<256x128xbf16>
    %24 = arith.extf %23 : vector<256x128xbf16> to vector<256x128xf32>
    %25 = arith.mulf %22, %24 : vector<256x128xf32>
    %26 = arith.truncf %25 : vector<256x128xf32> to vector<256x128xbf16>
    %c0_16 = arith.constant 0 : index
    %c0_17 = arith.constant 0 : index
    %27 = vector.load %arg6[%c0_16, %c0_17] : memref<128x128xbf16, #tpu.memory_space<vmem>>, vector<128x128xbf16>
    %cst_18 = arith.constant dense<0.000000e+00> : vector<256x128xf32>
    %28 = tpu.matmul %26, %27, %cst_18 {dimension_numbers = #tpu.dot_dimension_numbers<[1], [0], [0], [1], [0, 0, 1, 1], [], []>} : vector<256x128xbf16>, vector<128x128xbf16>, vector<256x128xf32> -> vector<256x128xf32>
    %c0_19 = arith.constant 0 : index
    %c0_20 = arith.constant 0 : index
    %29 = vector.load %arg7[%c0_19, %c0_20] : memref<1x128xf32, #tpu.memory_space<vmem>>, vector<1x128xf32>
    %30 = vector.broadcast %29 : vector<1x128xf32> to vector<256x128xf32>
    %31 = arith.addf %28, %30 : vector<256x128xf32>
    %c0_21 = arith.constant 0 : index
    %c0_22 = arith.constant 0 : index
    %32 = vector.load %arg10[%c0_21, %c0_22] : memref<256x128xf32, #tpu.memory_space<vmem>>, vector<256x128xf32>
    tpu.vector_store %arg10[%c0_21, %c0_22], %31 {strides = array<i32>} : memref<256x128xf32, #tpu.memory_space<vmem>>, vector<256x128xf32>,
    return
  }
  func.func @transform_0(%arg0: i32) -> (i32, i32) {
    %c0_i32 = arith.constant 0 : i32
    %c0_i32_0 = arith.constant 0 : i32
    return %arg0, %c0_i32 : i32, i32
  }
  func.func @transform_1(%arg0: i32) -> (i32, i32) {
    %c0_i32 = arith.constant 0 : i32
    %c0_i32_0 = arith.constant 0 : i32
    %c0_i32_1 = arith.constant 0 : i32
    return %c0_i32, %c0_i32_0 : i32, i32
  }
  func.func @transform_2(%arg0: i32) -> (i32, i32) {
    %c0_i32 = arith.constant 0 : i32
    %c0_i32_0 = arith.constant 0 : i32
    %c0_i32_1 = arith.constant 0 : i32
    return %c0_i32, %c0_i32_0 : i32, i32
  }
  func.func @transform_3(%arg0: i32) -> (i32, i32) {
    %c0_i32 = arith.constant 0 : i32
    %c0_i32_0 = arith.constant 0 : i32
    %c0_i32_1 = arith.constant 0 : i32
    return %c0_i32, %c0_i32_0 : i32, i32
  }
  func.func @transform_4(%arg0: i32) -> (i32, i32) {
    %c0_i32 = arith.constant 0 : i32
    %c0_i32_0 = arith.constant 0 : i32
    %c0_i32_1 = arith.constant 0 : i32
    return %c0_i32, %c0_i32_0 : i32, i32
  }
  func.func @transform_5(%arg0: i32) -> (i32, i32) {
    %c0_i32 = arith.constant 0 : i32
    %c0_i32_0 = arith.constant 0 : i32
    %c0_i32_1 = arith.constant 0 : i32
    return %c0_i32, %c0_i32_0 : i32, i32
  }
  func.func @transform_6(%arg0: i32) -> (i32, i32) {
    %c0_i32 = arith.constant 0 : i32
    %c0_i32_0 = arith.constant 0 : i32
    %c0_i32_1 = arith.constant 0 : i32
    return %c0_i32, %c0_i32_0 : i32, i32
  }
  func.func @transform_7(%arg0: i32) -> (i32, i32) {
    %c0_i32 = arith.constant 0 : i32
    %c0_i32_0 = arith.constant 0 : i32
    return %arg0, %c0_i32 : i32, i32
  }
  func.func @transform_8(%arg0: i32) -> (i32, i32) {
    %c0_i32 = arith.constant 0 : i32
    %c0_i32_0 = arith.constant 0 : i32
    return %arg0, %c0_i32 : i32, i32
  }
  func.func @transform_9(%arg0: i32) -> (i32, i32) {
    %c0_i32 = arith.constant 0 : i32
    %c0_i32_0 = arith.constant 0 : i32
    return %arg0, %c0_i32 : i32, i32
  }
}

</mosaic_0001>

<bundles_post_ra>
// kernel: tpu_custom_call.1
= control target key start
LH: loop header
LB: loop body
LE: loop exit
PB: predicated region body
PF: predicated region fallthrough
CT: control target
= control target key end

     0   :  { %s3593_s0 = inlined_call_operand.hbm [shape: f32[512,128], index: 0, kind: input, shape index: {}]   ;;  %s3594_s1 = inlined_call_operand.hbm [shape: bf16[128,128], index: 1, kind: input, shape index: {}]   ;;  %s3595_s2 = inlined_call_operand.vmem [shape: f32[1,128], index: 2, kind: input, shape index: {}]   ;;  %s3596_s3 = inlined_call_operand.hbm [shape: bf16[128,128], index: 3, kind: input, shape index: {}]   ;;  %s3597_s4 = inlined_call_operand.vmem [shape: f32[1,128], index: 4, kind: input, shape index: {}]   ;;  %s3598_s5 = inlined_call_operand.hbm [shape: bf16[128,128], index: 5, kind: input, shape index: {}]   ;;  %s3599_s6 = inlined_call_operand.vmem [shape: f32[1,128], index: 6, kind: input, shape index: {}]   ;;  %s3600_s7 = inlined_call_operand.hbm [shape: bf16[512,128], index: 7, kind: input, shape index: {}]   ;;  %s3601_s8 = inlined_call_operand.hbm [shape: bf16[512,128], index: 8, kind: input, shape index: {}]   ;;  %s3602_s9 = inlined_call_operand.hbm [shape: f32[512,128], index: 9, kind: output, shape index: {}]  }
   0x1   :  { %3645 = sst [smem:[#allocation45_spill]] %s3593_s0 }
   0x2   :  { %3646 = sst [smem:[#allocation46_spill]] %s3594_s1 }
   0x3   :  { %3647 = sst [smem:[#allocation47_spill]] %s3599_s6 }
   0x4   :  { %3648 = sst [smem:[#allocation48_spill]] %s3600_s7 }
   0x5   :  { %3649 = sst [smem:[#allocation49_spill]] %s3602_s9 }
   0x6   :  { %14 = vsyncpa [#allocation3], 0 }
   0x7   :  { %16 = vsyncpa [#allocation3 + $0x1], 0 }
   0x8   :  { %17 = vsyncpa [#allocation6], 0 }
   0x9   :  { %18 = vsyncpa [#allocation9], 0 }
   0xa   :  { %19 = vsyncpa [#allocation4], 0 }
   0xb   :  { %21 = vsyncpa [#allocation4 + $0x1], 0  ;;  %s2688_s30 = smov 0   ;;  %s2690_s10 = smov 0  }
   0xc   :  { %s2692_s11 = smov 0   ;;  %s2694_s12 = smov 0  }
   0xd LB: > { %3650 = sst [smem:[#allocation18_spill]] %s2611_s30  ;;  %s2709_s13 = sadd.s32 1, %s2623_s12   ;;  %s2623_s12 = sphi %s2694_s12, %s3729_s12   ;;  %s2619_s11 = sphi %s2692_s11, %s3731_s11   ;;  %s2615_s10 = sphi %s2690_s10, %s3733_s10   ;;  %s2611_s30 = sphi %s2688_s30, %s3732_s30  }
   0xe   : > { %3651 = sst [smem:[#allocation19_spill]] %s2619_s11  ;;  %s34_s14 = sadd.s32 1, %s2619_s11 }
   0xf   : > { %3652 = sst [smem:[#allocation20_spill]] %s2709_s13  ;;  %s31_s15 = ssub.s32 %s2623_s12, %s2709_s13 }
  0x10   : > { %p3603_p0 = scmp.ne.s32.totalorder %s2619_s11, %s2615_s10  ;;  %p32_p1 = scmp.eq.s32.totalorder %s31_s15, 0 }
  0x11   : > { %p42_p2 = scmp.eq.s32.totalorder %s2623_s12, 0  ;;  %p2286_p4 = scmp.lt.s32.totalorder %s2623_s12, 2 }
  0x12   : > { %s2720_s16 = scalar_select %p32_p1, %s2619_s11, %s34_s14  }
  0x13   : > { %p43_p5 = por %p42_p2, %p3603_p0  ;;  %s323_s17 = sand.u32 1, %s2623_s12  }
  0x14   : > { %3653 = sst [smem:[#allocation21_spill]] %s2720_s16  ;;  %s325_s18 = sand.u32 1, %s2619_s11  }
  0x15   : > { %s1796_s19 = sshll.u32 %s325_s18, 8  ;;  %s1845_s20 = sshll.u32 %s2623_s12, 12 }
  0x16   : > { %s3654_s0 = sld [smem:[#allocation45_spill]]  ;;  %s327_s24 = scalar_lea.vmem [#allocation2], %s1796_s19 }
  0x17   : > { %s334_s25 = sshll.u32 %s327_s24, 4  ;;  %p2735_p6 = pnand %p2286_p4, %p43_p5  ;;  %s2739_s25 = int_to_ptr.vmem [resolvable:$true] %s334_s25 }
  0x18   : > { %s2741_s27 = scalar_lea.sflag [#allocation3], %s323_s17 }
  0x19   : > { %s3655_s26 = scalar_select %p2735_p6, 1, 0 }
  0x1a   : > { %p2747_p8 = pneg %p2735_p6 }
  0x1c   : > { %s2733_s23 = scalar_lea.hbm %s3654_s0, %s1845_s20  ;;  %s2376_s19 = scalar_lea.hbm %s3654_s0, 8192 }
  0x1d   : > { %s2371_s28 = scalar_lea.hbm %s2733_s23, 4096  ;;  %p2377_p11 = scmp.lt.u32.totalorder %s2733_s23, %s3654_s0 }
  0x1e   : > { %p2372_p7 = scmp.ne.s32.totalorder %s2733_s23, %s2371_s28  ;;  %p2378_p12 = scmp.lt.u32.totalorder %s2376_s19, %s2371_s28 }
  0x1f   : > { %s3656_s29 = scalar_select %p2747_p8, 1, 0 }
  0x20   : > { %p2374_p9 = pnand %p2747_p8, %p2372_p7  ;;  %p2379_p13 = por %p2378_p12, %p2377_p11 }
  0x21   : > { %p2380_p1 = scmp.lt.u32.totalorder %s2371_s28, %s2733_s23 }
  0x22   : > { %p2375_p10 = pneg %p2374_p9 }
  0x23   : > { %p2381_p2 = por %p2380_p1, %p2379_p13 }
  0x25   : > { %p2382_p4 = pnand %p2381_p2, %p2375_p10 }
  0x27   : > { %2385 = shalt.err (!%p2382_p4)
}
  0x28   : > { %s2386_s17 = scalar_lea.vmem %s2739_s25, 4096  ;;  %s2625_s22 = smov [#allocation2]  }
  0x29   : > { %p2387_p5 = scmp.ne.s32.totalorder %s2739_s25, %s2386_s17  ;;  %s2391_s24 = sshll.u32 %s2625_s22, 4  ;;  %s2392_s24 = int_to_ptr.vmem [resolvable:$false] %s2391_s24 }
  0x2a   : > { %s2393_s14 = scalar_lea.vmem %s2392_s24, 8192  ;;  %p2394_p3 = scmp.lt.s32.totalorder %s2739_s25, %s2392_s24 }
  0x2b   : > { %p2389_p7 = pnand %p2387_p5, %p2747_p8  ;;  %p2395_p0 = scmp.lt.s32.totalorder %s2393_s14, %s2386_s17 }
  0x2d   : > { %p2390_p9 = pneg %p2389_p7  ;;  %p2396_p11 = por %p2395_p0, %p2394_p3 }
  0x2f   : > { %p2397_p12 = pnand %p2396_p11, %p2390_p9 }
  0x31   : > { %2400 = shalt.err (!%p2397_p12)
}
  0x32   : > { %s2626_s28 = smov 128   ;;  %s2627_s15 = smov 8  }
  0x33   : > { %2272 = dma.hbm_to_vmem [thread:$0]  (!%p2735_p6), %s2733_s23, 4096, %s2739_s25, %s2741_s27, %s2626_s28, %s2626_s28, %s2627_s15  }
  0x34   : > { %s2773_s19 = sshll.u32 %s325_s18, 7  ;;  %s2776_s20 = sadd.s32 4294967295, %s2623_s12  }
  0x35   : > { %s1790_s21 = sadd.s32 4294967294, %s2623_s12   ;;  %p47_p0 = scmp.ne.s32.totalorder %s2615_s10, %s2611_s30 }
  0x36   : > { %p3612_p3 = scmp.eq.s32.totalorder %s2776_s20, 0  ;;  %p249_p10 = scmp.eq.s32.totalorder %s2776_s20, 1 }
  0x37   : > { %p255_p13 = scmp.eq.s32.totalorder %s1790_s21, 1  ;;  %p1791_p1 = scmp.ge.s32.totalorder %s2623_s12, 1 }
  0x38   : > { %p2786_p2 = por %p3612_p3, %p47_p0  ;;  %p3658_p4 = scmp.ne.s32.totalorder %s2619_s11, %s2615_s10 }
  0x39   : > { %p2797_p7 = por %p255_p13, %p47_p0  ;;  %p262_p9 = scmp.lt.s32.totalorder %s2623_s12, 3 }
  0x3a   : > { %s3657_s23 = scalar_select %p2786_p2, 1, 0 }
  0x3b   : > { %p2793_p5 = por %p249_p10, %p3658_p4  ;;  %p2802_p11 = pnand %p1791_p1, %p262_p9 }
  0x3c   : > { %s3661_s25 = scalar_select %p2797_p7, 1, 0 }
  0x3d   : > { %s3659_s18 = scalar_select %p2793_p5, 1, 0 }
  0x3e   : > { %3662 = sst [smem:[#allocation23_spill]] %s3661_s25  ;;  %s2628_s22 = smov [#allocation5]  }
  0x3f   : > { %3660 = sst [smem:[#allocation22_spill]] %s3659_s18  ;;  %s274_s24 = sshll.u32 %s2628_s22, 4  ;;  %s2806_s24 = int_to_ptr.vmem [resolvable:$true] %s274_s24 }
  0x40   : > { %s3663_s17 = scalar_select %p2802_p11, 1, 0 }
  0x41   : > { %p2259_p12 = pneg %p2802_p11  ;;  %s3616_s14 = sshll.u32 %s2623_s12, 11 }
  0x42   : > { %s3665_s7 = sld [smem:[#allocation48_spill]]  ;;  %s348_s16 = scalar_lea.vmem [#allocation10], %s2773_s19 }
  0x43   : > { %p2813_p10 = pnand %p2259_p12, %p3612_p3  ;;  %s355_s11 = sshll.u32 %s348_s16, 4  ;;  %s2825_s11 = int_to_ptr.vmem [resolvable:$true] %s355_s11 }
  0x44   : > { %s3666_s1 = sld [smem:[#allocation46_spill]] }
  0x45   : > { %s3664_s28 = scalar_select %p2813_p10, 1, 0 }
  0x46   : > { %p2835_p13 = pneg %p2813_p10 }
  0x48   : > { %s2822_s0 = scalar_lea.hbm %s3665_s7, %s3616_s14 }
  0x49   : > { %s3667_s18 = scalar_select %p2835_p13, 1, 0 }
  0x4a   : > { %s2401_s25 = scalar_lea.hbm %s3666_s1, 1024 }
  0x4b   : > { %p2402_p0 = scmp.ne.s32.totalorder %s3666_s1, %s2401_s25  ;;  %p2408_p9 = scmp.lt.u32.totalorder %s2401_s25, %s3666_s1 }
  0x4d   : > { %p2404_p1 = pnand %p2835_p13, %p2402_p0 }
  0x4f   : > { %p2405_p4 = pneg %p2404_p1 }
  0x51   : > { %p2410_p12 = pnand %p2408_p9, %p2405_p4 }
  0x53   : > { %2413 = shalt.err (!%p2410_p12)
}
  0x54   : > { %s2414_s9 = scalar_lea.vmem %s2806_s24, 1024  ;;  %p2422_p2 = scmp.lt.s32.totalorder %s2806_s24, %s2806_s24 }
  0x55   : > { %p2415_p3 = scmp.ne.s32.totalorder %s2806_s24, %s2414_s9  ;;  %p2423_p11 = scmp.lt.s32.totalorder %s2414_s9, %s2414_s9 }
  0x57   : > { %p2417_p7 = pnand %p2415_p3, %p2835_p13  ;;  %p2424_p0 = por %p2423_p11, %p2422_p2 }
  0x59   : > { %p2418_p5 = pneg %p2417_p7 }
  0x5b   : > { %p2425_p1 = pnand %p2424_p0, %p2418_p5 }
  0x5d   : > { %2428 = shalt.err (!%p2425_p1)
}
  0x5e   : > { %s2629_s30 = smov 64   ;;  %s2630_s13 = smov 4  }
  0x5f   : > { %2262 = dma.hbm_to_vmem [thread:$0]  (!%p2813_p10), %s3666_s1, 1024, %s2806_s24, [#allocation6], %s2629_s30, %s2629_s30, %s2630_s13  }
  0x60   : > { %s2429_s22 = scalar_lea.hbm %s2822_s0, 2048  ;;  %s2434_s9 = scalar_lea.hbm %s3665_s7, 4096 }
  0x61   : > { %p2430_p3 = scmp.ne.s32.totalorder %s2822_s0, %s2429_s22  ;;  %p2435_p7 = scmp.lt.u32.totalorder %s2822_s0, %s3665_s7 }
  0x62   : > { %p2436_p11 = scmp.lt.u32.totalorder %s2434_s9, %s2429_s22  ;;  %p2438_p9 = scmp.lt.u32.totalorder %s2429_s22, %s2822_s0 }
  0x63   : > { %p2432_p2 = pnand %p2430_p3, %p2747_p8 }
  0x64   : > { %p2437_p4 = por %p2436_p11, %p2435_p7 }
  0x65   : > { %p2433_p5 = pneg %p2432_p2 }
  0x66   : > { %p2439_p12 = por %p2438_p9, %p2437_p4 }
  0x68   : > { %p2440_p0 = pnand %p2439_p12, %p2433_p5 }
  0x6a   : > { %2443 = shalt.err (!%p2440_p0)
}
  0x6b   : > { %s2444_s24 = scalar_lea.vmem %s2825_s11, 2048  ;;  %s2631_s25 = smov [#allocation10]  }
  0x6c   : > { %p2445_p1 = scmp.ne.s32.totalorder %s2825_s11, %s2444_s24  ;;  %s2449_s21 = sshll.u32 %s2631_s25, 4  ;;  %s2450_s21 = int_to_ptr.vmem [resolvable:$false] %s2449_s21 }
  0x6d   : > { %s2451_s6 = scalar_lea.vmem %s2450_s21, 4096  ;;  %p2452_p10 = scmp.lt.s32.totalorder %s2825_s11, %s2450_s21 }
  0x6e   : > { %p2447_p3 = pnand %p2445_p1, %p2747_p8  ;;  %p2453_p13 = scmp.lt.s32.totalorder %s2451_s6, %s2444_s24 }
  0x70   : > { %p2448_p2 = pneg %p2447_p3  ;;  %p2454_p7 = por %p2453_p13, %p2452_p10 }
  0x72   : > { %p2455_p11 = pnand %p2454_p7, %p2448_p2 }
  0x74   : > { %2458 = shalt.err (!%p2455_p11)
}
  0x75   : > { %2275 = dma.hbm_to_vmem [thread:$0]  (!%p2735_p6), %s2822_s0, 2048, %s2825_s11, %s2741_s27, %s2629_s30, %s2629_s30, %s2630_s13  }
  0x76   : > { %s2632_s14 = smov [#allocation7]   ;;  %s2633_s16 = smov [#allocation8]  }
  0x77   : > { %s290_s22 = sshll.u32 %s2632_s14, 4  ;;  %s306_s15 = sshll.u32 %s2633_s16, 4  ;;  %s291_s22 = int_to_ptr.vmem [resolvable:$true] %s290_s22  ;;  %s307_s15 = int_to_ptr.vmem [resolvable:$true] %s306_s15 }
  0x78   : > { %s2459_s25 = scalar_lea.hbm %s3596_s3, 1024  ;;  %p3668_p13 = scmp.ne.s32.totalorder %s3667_s18, 0 }
  0x79   : > { %p2460_p10 = scmp.ne.s32.totalorder %s3596_s3, %s2459_s25  ;;  %p2466_p9 = scmp.lt.u32.totalorder %s2459_s25, %s3596_s3 }
  0x7b   : > { %p2462_p5 = pnand %p2460_p10, %p3668_p13 }
  0x7d   : > { %p2463_p4 = pneg %p2462_p5 }
  0x7f   : > { %p2468_p12 = pnand %p2466_p9, %p2463_p4 }
  0x81   : > { %2471 = shalt.err (!%p2468_p12)
}
  0x82   : > { %s2472_s0 = scalar_lea.vmem %s291_s22, 1024  ;;  %p2480_p2 = scmp.lt.s32.totalorder %s291_s22, %s291_s22 }
  0x83   : > { %p2473_p0 = scmp.ne.s32.totalorder %s291_s22, %s2472_s0  ;;  %p2481_p7 = scmp.lt.s32.totalorder %s2472_s0, %s2472_s0 }
  0x85   : > { %p2475_p1 = pnand %p2473_p0, %p3668_p13  ;;  %p2482_p11 = por %p2481_p7, %p2480_p2 }
  0x87   : > { %p2476_p3 = pneg %p2475_p1 }
  0x89   : > { %p2483_p6 = pnand %p2482_p11, %p2476_p3 }
  0x8b   : > { %2486 = shalt.err (!%p2483_p6)
}
  0x8c   : > { %p3669_p10 = scmp.ne.s32.totalorder %s3664_s28, 0  ;;  %s2487_s16 = scalar_lea.hbm %s3598_s5, 1024 }
  0x8d   : > { %p2488_p5 = scmp.ne.s32.totalorder %s3598_s5, %s2487_s16  ;;  %p2494_p9 = scmp.lt.u32.totalorder %s2487_s16, %s3598_s5 }
  0x8e   : > { %2265 = dma.hbm_to_vmem [thread:$0]  (!%p3669_p10), %s3596_s3, 1024, %s291_s22, [#allocation6], %s2629_s30, %s2629_s30, %s2630_s13  }
  0x8f   : > { %p2490_p6 = pnand %p2488_p5, %p3668_p13 }
  0x91   : > { %p2491_p4 = pneg %p2490_p6 }
  0x93   : > { %p2496_p12 = pnand %p2494_p9, %p2491_p4 }
  0x95   : > { %2499 = shalt.err (!%p2496_p12)
}
  0x96   : > { %s2500_s6 = scalar_lea.vmem %s307_s15, 1024  ;;  %p2508_p2 = scmp.lt.s32.totalorder %s307_s15, %s307_s15 }
  0x97   : > { %p2501_p0 = scmp.ne.s32.totalorder %s307_s15, %s2500_s6  ;;  %p2509_p7 = scmp.lt.s32.totalorder %s2500_s6, %s2500_s6 }
  0x99   : > { %p2503_p1 = pnand %p2501_p0, %p3668_p13  ;;  %p2510_p11 = por %p2509_p7, %p2508_p2 }
  0x9b   : > { %p2504_p3 = pneg %p2503_p1 }
  0x9d   : > { %p2511_p8 = pnand %p2510_p11, %p2504_p3 }
  0x9f   : > { %2514 = shalt.err (!%p2511_p8)
}
  0xa0   : > { %2268 = dma.hbm_to_vmem [thread:$0]  (!%p3669_p10), %s3598_s5, 1024, %s307_s15, [#allocation9], %s2629_s30, %s2629_s30, %s2630_s13  }
  0xa1   : > { %s3670_s18 = sshll.u32 %s2623_s12, 11  ;;  %s369_s28 = scalar_lea.vmem [#allocation11], %s2773_s19 }
  0xa2   : > { %s2931_s11 = scalar_lea.hbm %s3601_s8, %s3670_s18  ;;  %s376_s14 = sshll.u32 %s369_s28, 4  ;;  %s2934_s14 = int_to_ptr.vmem [resolvable:$true] %s376_s14 }
  0xa3   : > { %s2515_s16 = scalar_lea.hbm %s2931_s11, 2048  ;;  %p3671_p13 = scmp.ne.s32.totalorder %s3656_s29, 0 }
  0xa4   : > { %p2516_p8 = scmp.ne.s32.totalorder %s2931_s11, %s2515_s16  ;;  %s2520_s24 = scalar_lea.hbm %s3601_s8, 4096 }
  0xa5   : > { %p2521_p10 = scmp.lt.u32.totalorder %s2931_s11, %s3601_s8  ;;  %p2522_p4 = scmp.lt.u32.totalorder %s2520_s24, %s2515_s16 }
  0xa6   : > { %p2518_p5 = pnand %p2516_p8, %p3671_p13  ;;  %p2524_p12 = scmp.lt.u32.totalorder %s2515_s16, %s2931_s11 }
  0xa7   : > { %p2523_p9 = por %p2522_p4, %p2521_p10 }
  0xa8   : > { %p2519_p6 = pneg %p2518_p5 }
  0xa9   : > { %p2525_p0 = por %p2524_p12, %p2523_p9 }
  0xab   : > { %p2526_p1 = pnand %p2525_p0, %p2519_p6 }
  0xad   : > { %2529 = shalt.err (!%p2526_p1)
}
  0xae   : > { %s2530_s19 = scalar_lea.vmem %s2934_s14, 2048  ;;  %s2634_s6 = smov [#allocation11]  }
  0xaf   : > { %p2531_p3 = scmp.ne.s32.totalorder %s2934_s14, %s2530_s19  ;;  %s2535_s22 = sshll.u32 %s2634_s6, 4  ;;  %s2536_s22 = int_to_ptr.vmem [resolvable:$false] %s2535_s22 }
  0xb0   : > { %s2537_s0 = scalar_lea.vmem %s2536_s22, 4096  ;;  %p2538_p11 = scmp.lt.s32.totalorder %s2934_s14, %s2536_s22 }
  0xb1   : > { %p2533_p2 = pnand %p2531_p3, %p3671_p13  ;;  %p2539_p8 = scmp.lt.s32.totalorder %s2537_s0, %s2530_s19 }
  0xb3   : > { %p2534_p7 = pneg %p2533_p2  ;;  %p2540_p5 = por %p2539_p8, %p2538_p11 }
  0xb5   : > { %p2541_p10 = pnand %p2540_p5, %p2534_p7 }
  0xb7   : > { %2544 = shalt.err (!%p2541_p10)
}
  0xb8   : > { %p3672_p6 = scmp.ne.s32.totalorder %s3655_s26, 0  ;;  %p3673_p13 = scmp.ne.s32.totalorder %s3663_s17, 0 }
  0xba   : > { %2278 = dma.hbm_to_vmem [thread:$0]  (!%p3672_p6), %s2931_s11, 2048, %s2934_s14, %s2741_s27, %s2629_s30, %s2629_s30, %s2630_s13  }
  0xbb   : > { %388 = sbr.rel (%p3673_p13) target bundleno = 983 (0x3d7), region = 56 }
  0xc2   : > { %s390_s29 = sand.u32 1, %s2776_s20   ;;  %s2965_s18 = sand.u32 1, %s2615_s10  }
  0xc3   : > { %s1806_s1 = sshll.u32 %s2965_s18, 8  ;;  %s391_s26 = scalar_lea.sflag [#allocation3], %s390_s29 }
  0xc4   : > { %s2970_s7 = scalar_lea.vmem [#allocation2], %s1806_s1  ;;  %p3674_p4 = scmp.ne.s32.totalorder %s3657_s23, 0 }
  0xc6   : > { %2590 = dma.done.wait (%p3674_p4), %s391_s26, 4096  }
  0xc7   : > { %2592 = vsyncadd (%p3674_p4), %s391_s26, 4294963200  ;;  %p3675_p9 = scmp.eq.s32.totalorder %s2776_s20, 0 }
  0xc9   : > { %2594 = dma.done.wait (%p3675_p9), [#allocation6], 2048   ;;  %p3676_p12 = pmov %p3675_p9 }
  0xca   : > { %p3677_p0 = pmov %p3675_p9 }
  0xcb   : > { %2596 = vsyncadd (%p3676_p12), [#allocation6], 4294965248 }
  0xcc   : > { %2598 = dma.done.wait (%p3677_p0), [#allocation9], 1024   ;;  %p3678_p1 = pmov %p3677_p0 }
  0xcd   : > { %s1810_s27 = sshll.u32 %s2965_s18, 7 }
  0xce   : > { %2600 = vsyncadd (%p3678_p1), [#allocation9], 4294966272  ;;  %s2987_s17 = scalar_lea.vmem [#allocation10], %s1810_s27 }
  0xcf   : > { %2602 = dma.done.wait (%p3674_p4), %s391_s26, 4096  }
  0xd0   : > { %2604 = vsyncadd (%p3674_p4), %s391_s26, 4294963200  ;;  %v2332_v0 = vld [vmem:[#allocation5] sm:$0xff]   ;;  %v2333_v1 = vld [vmem:[#allocation5 + $0x8] sm:$0xff]   ;;  %s3358_s28 = scalar_lea.vmem [#allocation11], %s1810_s27  ;;  %s3721_s15 = sld [smem:[#allocation47_spill]] }
  0xd1   : > { %2079 = vmatprep.subr.bf16.mxu0 %v2332_v0  ;;  %2223 = vmatprep.subr.bf16.mxu1 %v2332_v0  ;;  %v2334_v2 = vld [vmem:[#allocation5 + $0x10] sm:$0xff]   ;;  %v2335_v3 = vld [vmem:[#allocation5 + $0x18] sm:$0xff]   ;;  %v2994_v4 = vld [vmem:[%s2970_s7] sm:$0xff]  ;;  %s3478_s9 = scalar_lea.vmem [#allocation12], %s1806_s1  ;;  %s1848_s24 = sshll.u32 %s2776_s20, 12 }
  0xd2   : > { %2080 = vmatpush3.bf16.msra.mxu0 %v2332_v0  ;;  %2231 = vmatpush3.bf16.msra.mxu1 %v2332_v0  ;;  %3679 = vst [vmem:[#allocation24_spill] sm:$0xff] %v2994_v4  ;;  %v2997_v5 = vld [vmem:[%s2970_s7 + $0x8] sm:$0xff]  ;;  %v2336_v7 = vld [vmem:[#allocation5 + $0x20] sm:$0xff]   ;;  %v2338_v12 = vld [vmem:[#allocation5 + $0x30] sm:$0xff]   ;;  %s1648_s25 = sshll.u32 %s3478_s9, 4  ;;  %s3722_s21 = sld [smem:[#allocation22_spill]]  ;;  %s3545_s25 = int_to_ptr.vmem [resolvable:$true] %s1648_s25 }
  0xd3   : > { %2081 = vmatprep.subr.bf16.mxu0 %v2333_v1  ;;  %2224 = vmatprep.subr.bf16.mxu1 %v2333_v1  ;;  %3680 = vst [vmem:[#allocation25_spill] sm:$0xff] %v2997_v5  ;;  %v506_v6 = vpack.c.bf16 %v2997_v5, %v2994_v4  ;;  %v3002_v8 = vld [vmem:[%s2970_s7 + $0x80] sm:$0xff]  ;;  %v3005_v9 = vld [vmem:[%s2970_s7 + $0x88] sm:$0xff]  ;;  %v2339_v13 = vld [vmem:[#allocation5 + $0x38] sm:$0xff]   ;;  %s3723_s22 = sld [smem:[#allocation49_spill]]  ;;  %s1635_s20 = scalar_lea.sflag [#allocation4], %s2965_s18 }
  0xd4   : > { %v514_v10 = vpack.c.bf16 %v3005_v9, %v3002_v8  ;;  %v2337_v11 = vld [vmem:[#allocation5 + $0x28] sm:$0xff]   ;;  %v3010_v14 = vld [vmem:[%s2970_s7 + $0x10] sm:$0xff]  ;;  %v3013_v15 = vld [vmem:[%s2970_s7 + $0x18] sm:$0xff]  ;;  %s2545_s29 = scalar_lea.vmem %s3545_s25, 4096  ;;  %s2635_s1 = smov [#allocation12]  }
  0xd5   : > { %2095 = vmatprep.mubr.bf16.mxu0 %v506_v6  ;;  %3681 = vst [vmem:[#allocation26_spill] sm:$0xff] %v3010_v14  ;;  %3682 = vst [vmem:[#allocation27_spill] sm:$0xff] %v3013_v15  ;;  %v3016_v16 = vld [vmem:[%s2970_s7 + $0x20] sm:$0xff]  ;;  %v3019_v17 = vld [vmem:[%s2970_s7 + $0x28] sm:$0xff]  ;;  %v507_v23 = vpack.c.bf16 %v3013_v15, %v3010_v14  ;;  %p2546_p3 = scmp.ne.s32.totalorder %s3545_s25, %s2545_s29  ;;  %s2549_s26 = sshll.u32 %s2635_s1, 4  ;;  %s2550_s26 = int_to_ptr.vmem [resolvable:$false] %s2549_s26 }
  0xd6   : > { %2082 = vmatpush3.bf16.msra.mxu0 %v2333_v1  ;;  %2232 = vmatpush3.bf16.msra.mxu1 %v2333_v1  ;;  %3683 = vst [vmem:[#allocation28_spill] sm:$0xff] %v3016_v16  ;;  %3684 = vst [vmem:[#allocation29_spill] sm:$0xff] %v3019_v17  ;;  %v3022_v18 = vld [vmem:[%s2970_s7 + $0x90] sm:$0xff]  ;;  %v3025_v19 = vld [vmem:[%s2970_s7 + $0x98] sm:$0xff]  ;;  %v508_v24 = vpack.c.bf16 %v3019_v17, %v3016_v16  ;;  %p2552_p8 = scmp.lt.s32.totalorder %s3545_s25, %s2550_s26 }
  0xd7   : > { %2083 = vmatprep.subr.bf16.mxu0 %v2334_v2  ;;  %2225 = vmatprep.subr.bf16.mxu1 %v2334_v2  ;;  %v3028_v20 = vld [vmem:[%s2970_s7 + $0xa0] sm:$0xff]  ;;  %v3031_v21 = vld [vmem:[%s2970_s7 + $0xa8] sm:$0xff]  ;;  %v515_v25 = vpack.c.bf16 %v3025_v19, %v3022_v18  ;;  %v3042_v28 = vld [vmem:[%s2970_s7 + $0x30] sm:$0xff] }
  0xd8   : > { %2111 = vmatprep.mubr.bf16.mxu1 %v514_v10  ;;  %v2340_v22 = vld [vmem:[#allocation7] sm:$0xff]   ;;  %v516_v26 = vpack.c.bf16 %v3031_v21, %v3028_v20  ;;  %v2341_v27 = vld [vmem:[#allocation7 + $0x8] sm:$0xff]   ;;  %3685 = vst [vmem:[#allocation30_spill] sm:$0xff] %v3042_v28  ;;  %v3045_v29 = vld [vmem:[%s2970_s7 + $0x38] sm:$0xff]  ;;  %p3724_p2 = scmp.ne.s32.totalorder %s3722_s21, 0 }
  0xd9   : > { %3686 = vst [vmem:[#allocation31_spill] sm:$0xff] %v3045_v29  ;;  %v3048_v30 = vld [vmem:[%s2970_s7 + $0x40] sm:$0xff]  ;;  %v3051_v31 = vld [vmem:[%s2970_s7 + $0x48] sm:$0xff]  ;;  %v3054_v32 = vld [vmem:[%s2970_s7 + $0xb0] sm:$0xff]  ;;  %v509_v37 = vpack.c.bf16 %v3045_v29, %v3042_v28  ;;  %s3543_s0 = scalar_lea.hbm %s3723_s22, %s1848_s24 }
  0xda   : > { %2084 = vmatpush3.bf16.msra.mxu0 %v2334_v2  ;;  %2233 = vmatpush3.bf16.msra.mxu1 %v2334_v2  ;;  %3687 = vst [vmem:[#allocation32_spill] sm:$0xff] %v3048_v30  ;;  %3688 = vst [vmem:[#allocation33_spill] sm:$0xff] %v3051_v31  ;;  %v3057_v33 = vld [vmem:[%s2970_s7 + $0xb8] sm:$0xff]  ;;  %v3060_v34 = vld [vmem:[%s2970_s7 + $0xc0] sm:$0xff]  ;;  %v510_v38 = vpack.c.bf16 %v3051_v31, %v3048_v30  ;;  %p2547_p7 = pnand %p2546_p3, %p3724_p2 }
  0xdb   : > { %2085 = vmatprep.subr.bf16.mxu0 %v2335_v3  ;;  %2226 = vmatprep.subr.bf16.mxu1 %v2335_v3  ;;  %v3063_v35 = vld [vmem:[%s2970_s7 + $0xc8] sm:$0xff]  ;;  %v2342_v36 = vld [vmem:[#allocation7 + $0x10] sm:$0xff]   ;;  %v517_v39 = vpack.c.bf16 %v3057_v33, %v3054_v32  ;;  %v2343_v41 = vld [vmem:[#allocation7 + $0x18] sm:$0xff]  }
  0xdc   : > { %v518_v40 = vpack.c.bf16 %v3063_v35, %v3060_v34  ;;  %v3074_v42 = vld [vmem:[%s2970_s7 + $0x50] sm:$0xff]  ;;  %v3077_v43 = vld [vmem:[%s2970_s7 + $0x58] sm:$0xff]  ;;  %v3080_v44 = vld [vmem:[%s2970_s7 + $0x60] sm:$0xff]  ;;  %p2548_p11 = pneg %p2547_p7 }
  0xdd   : > { %3689 = vst [vmem:[#allocation34_spill] sm:$0xff] %v3074_v42  ;;  %3690 = vst [vmem:[#allocation35_spill] sm:$0xff] %v3077_v43  ;;  %v3083_v45 = vld [vmem:[%s2970_s7 + $0x68] sm:$0xff]  ;;  %v3086_v46 = vld [vmem:[%s2970_s7 + $0xd0] sm:$0xff]  ;;  %v511_v51 = vpack.c.bf16 %v3077_v43, %v3074_v42 }
  0xde   : > { %2086 = vmatpush3.bf16.msra.mxu0 %v2335_v3  ;;  %2234 = vmatpush3.bf16.msra.mxu1 %v2335_v3  ;;  %3691 = vst [vmem:[#allocation36_spill] sm:$0xff] %v3080_v44  ;;  %v3089_v47 = vld [vmem:[%s2970_s7 + $0xd8] sm:$0xff]  ;;  %v3092_v48 = vld [vmem:[%s2970_s7 + $0xe0] sm:$0xff]  ;;  %v3095_v49 = vld [vmem:[%s2970_s7 + $0xe8] sm:$0xff]  ;;  %v512_v52 = vpack.c.bf16 %v3083_v45, %v3080_v44 }
  0xdf   : > { %2087 = vmatprep.subr.bf16.mxu0 %v2336_v7  ;;  %2227 = vmatprep.subr.bf16.mxu1 %v2336_v7  ;;  %v2344_v50 = vld [vmem:[#allocation7 + $0x20] sm:$0xff]   ;;  %v519_v53 = vpack.c.bf16 %v3089_v47, %v3086_v46  ;;  %v520_v54 = vpack.c.bf16 %v3095_v49, %v3092_v48  ;;  %v3106_v55 = vld [vmem:[%s2970_s7 + $0x70] sm:$0xff]  ;;  %v3109_v56 = vld [vmem:[%s2970_s7 + $0x78] sm:$0xff] }
  0xe0   : > { %v3112_v57 = vld [vmem:[%s2970_s7 + $0xf0] sm:$0xff]  ;;  %v3115_v58 = vld [vmem:[%s2970_s7 + $0xf8] sm:$0xff]  ;;  %v513_v59 = vpack.c.bf16 %v3109_v56, %v3106_v55  ;;  %v2345_v61 = vld [vmem:[#allocation7 + $0x28] sm:$0xff]  }
  0xe1   : > { %v521_v60 = vpack.c.bf16 %v3115_v58, %v3112_v57  ;;  %v2346_v62 = vld [vmem:[#allocation7 + $0x30] sm:$0xff]   ;;  %v2347_v63 = vld [vmem:[#allocation7 + $0x38] sm:$0xff]   ;;  %v2348_v0 = vld [vmem:[#allocation8] sm:$0xff]  }
  0xe2   : > { %2088 = vmatpush3.bf16.msra.mxu0 %v2336_v7  ;;  %2235 = vmatpush3.bf16.msra.mxu1 %v2336_v7  ;;  %v2349_v1 = vld [vmem:[#allocation8 + $0x8] sm:$0xff]   ;;  %v2350_v2 = vld [vmem:[#allocation8 + $0x10] sm:$0xff]   ;;  %v2351_v3 = vld [vmem:[#allocation8 + $0x18] sm:$0xff]  }
  0xe3   : > { %2089 = vmatprep.subr.bf16.mxu0 %v2337_v11  ;;  %2228 = vmatprep.subr.bf16.mxu1 %v2337_v11  ;;  %v3124_v6 = vld [vmem:[%s3595_s2] ss:$0 sm:$0xff] }
  0xe6   : > { %2090 = vmatpush3.bf16.msra.mxu0 %v2337_v11  ;;  %2236 = vmatpush3.bf16.msra.mxu1 %v2337_v11 }
  0xe7   : > { %2091 = vmatprep.subr.bf16.mxu0 %v2338_v12  ;;  %2229 = vmatprep.subr.bf16.mxu1 %v2338_v12 }
  0xea   : > { %2092 = vmatpush3.bf16.msra.mxu0 %v2338_v12  ;;  %2237 = vmatpush3.bf16.msra.mxu1 %v2338_v12 }
  0xeb   : > { %2093 = vmatprep.subr.bf16.mxu0 %v2339_v13  ;;  %2230 = vmatprep.subr.bf16.mxu1 %v2339_v13 }
  0xee   : > { %2094 = vmatpush3.bf16.msra.mxu0 %v2339_v13  ;;  %2238 = vmatpush3.bf16.msra.mxu1 %v2339_v13 }
  0xef   : > { %2127 = vmatprep.subr.bf16.mxu1 %v2340_v22  ;;  %2175 = vmatprep.subr.bf16.mxu0 %v2348_v0 }
  0xf1   : > { %2096 = vmatmul.mubr.bf16.vlgmr.msra.gmra.mrb[0].mxu0 %v507_v23  ;;  %2112 = vmatmul.mubr.bf16.vlgmr.msra.gmra.mrb[0].mxu1 %v515_v25  ;;  %v1850_v25 = vld [vmem:[%s2987_s17] sm:$0xff]  }
  0xf2   : > { %2099 = vmatprep.mubr.bf16.mxu0 %v508_v24  ;;  %2115 = vmatprep.mubr.bf16.mxu1 %v516_v26 }
  0xf3   : > { %2128 = vmatpush3.bf16.msra.mxu1 %v2340_v22  ;;  %2176 = vmatpush3.bf16.msra.mxu0 %v2348_v0 }
  0xf4   : > { %2129 = vmatprep.subr.bf16.mxu1 %v2341_v27  ;;  %2177 = vmatprep.subr.bf16.mxu0 %v2349_v1 }
  0xf7   : > { %2130 = vmatpush3.bf16.msra.mxu1 %v2341_v27  ;;  %2178 = vmatpush3.bf16.msra.mxu0 %v2349_v1 }
  0xf8   : > { %2131 = vmatprep.subr.bf16.mxu1 %v2342_v36  ;;  %2179 = vmatprep.subr.bf16.mxu0 %v2350_v2 }
  0xf9   : > { %2100 = vmatmul.mubr.bf16.gmra.mrb[4].mxu0 %v509_v37  ;;  %2116 = vmatmul.mubr.bf16.gmra.mrb[4].mxu1 %v517_v39  ;;  %v1977_v37 = vld [vmem:[%s2987_s17 + $0x8] sm:$0xff]  }
  0xfa   : > { %2103 = vmatprep.mubr.bf16.mxu0 %v510_v38  ;;  %2119 = vmatprep.mubr.bf16.mxu1 %v518_v40 }
  0xfb   : > { %2132 = vmatpush3.bf16.msra.mxu1 %v2342_v36  ;;  %2180 = vmatpush3.bf16.msra.mxu0 %v2350_v2 }
  0xfc   : > { %2133 = vmatprep.subr.bf16.mxu1 %v2343_v41  ;;  %2181 = vmatprep.subr.bf16.mxu0 %v2351_v3 }
  0xff   : > { %2134 = vmatpush3.bf16.msra.mxu1 %v2343_v41  ;;  %2182 = vmatpush3.bf16.msra.mxu0 %v2351_v3 }
 0x100   : > { %2135 = vmatprep.subr.bf16.mxu1 %v2344_v50 }
 0x101   : > { %2104 = vmatmul.mubr.bf16.gmra.mrb[8].mxu0 %v511_v51  ;;  %2120 = vmatmul.mubr.bf16.gmra.mrb[8].mxu1 %v519_v53 }
 0x102   : > { %2107 = vmatprep.mubr.bf16.mxu0 %v512_v52  ;;  %2123 = vmatprep.mubr.bf16.mxu1 %v520_v54  ;;  %v1851_v52 = vunpack.c.l.bf16 %v1850_v25  ;;  %v1852_v54 = vunpack.c.h.bf16 %v1850_v25 }
 0x103   : > { %2136 = vmatpush3.bf16.msra.mxu1 %v2344_v50  ;;  %v1856_v50 = vunpack.c.h.bf16 %v1977_v37 }
 0x104   : > { %2137 = vmatprep.subr.bf16.mxu1 %v2345_v61 }
 0x107   : > { %2138 = vmatpush3.bf16.msra.mxu1 %v2345_v61 }
 0x108   : > { %2139 = vmatprep.subr.bf16.mxu1 %v2346_v62 }
 0x109   : > { %2108 = vmatmul.mubr.bf16.gmra.mrb[12].mxu0 %v513_v59  ;;  %2124 = vmatmul.mubr.bf16.gmra.mrb[12].mxu1 %v521_v60  ;;  %v1855_v60 = vunpack.c.l.bf16 %v1977_v37 }
 0x10b   : > { %2140 = vmatpush3.bf16.msra.mxu1 %v2346_v62 }
 0x10c   : > { %2141 = vmatprep.subr.bf16.mxu1 %v2347_v63 }
 0x10f   : > { %2142 = vmatpush3.bf16.msra.mxu1 %v2347_v63 }
 0x1c4   : > { %v2097_v7 = vpop.f32.mrb[0].mxu0  ;;  %v3127_v12 = vpop.f32.mrb[0].mxu1 }
 0x1c5   : > { %v636_v10 = vadd.f32 %v2097_v7, %v3124_v6  ;;  %v627_v11 = vpop.f32.mrb[1].mxu0  ;;  %v691_v23 = vpop.f32.mrb[1].mxu1 }
 0x1c6   : > { %v628_v13 = vadd.f32 %v3124_v6, %v627_v11  ;;  %v2098_v22 = vpop.f32.mrb[2].mxu0  ;;  %v3132_v36 = vpop.f32.mrb[2].mxu1 }
 0x1c7   : > { %v756_v24 = vmax.f32 %v636_v10, 0.0  ;;  %v639_v26 = vadd.f32 %v2098_v22, %v3124_v6  ;;  %v630_v27 = vpop.f32.mrb[3].mxu0  ;;  %v694_v40 = vpop.f32.mrb[3].mxu1 }
 0x1c8   : > { %v754_v38 = vmax.f32 %v628_v13, 0.0  ;;  %v631_v39 = vadd.f32 %v3124_v6, %v630_v27 }
 0x1c9   : > { %v757_v41 = vmax.f32 %v639_v26, 0.0  ;;  %v788_v59 = vadd.f32 %v756_v24, %v3010_v14  ;;  %v1978_v26 = vld [vmem:[%s2987_s17 + $0x10] sm:$0xff]  }
 0x1ca   : > { %v786_v51 = vadd.f32 %v754_v38, %v2994_v4  ;;  %v755_v53 = vmax.f32 %v631_v39, 0.0  ;;  %v1979_v39 = vld [vmem:[%s2987_s17 + $0x18] sm:$0xff]  }
 0x1cb   : > { %v789_v61 = vadd.f32 %v757_v41, %v3013_v15  ;;  %v3152_v24 = vmul.f32 %v1855_v60, %v788_v59  ;;  %v1864_v59 = vunpack.c.h.bf16 %v1979_v39 }
 0x1cc   : > { %v787_v62 = vadd.f32 %v755_v53, %v2997_v5  ;;  %v2101_v63 = vpop.f32.mrb[4].mxu0  ;;  %v3143_v3 = vpop.f32.mrb[4].mxu1  ;;  %v3145_v7 = vmul.f32 %v1851_v52, %v786_v51 }
 0x1cd   : > { %v3140_v0 = vmul.f32 %v1856_v50, %v789_v61  ;;  %v652_v1 = vadd.f32 %v2101_v63, %v3124_v6  ;;  %v643_v2 = vpop.f32.mrb[5].mxu0  ;;  %v3150_v22 = vpop.f32.mrb[5].mxu1  ;;  %v1859_v61 = vunpack.c.l.bf16 %v1978_v26  ;;  %v1860_v63 = vunpack.c.h.bf16 %v1978_v26 }
 0x1ce   : > { %v3147_v10 = vmul.f32 %v1852_v54, %v787_v62  ;;  %v644_v11 = vadd.f32 %v3124_v6, %v643_v2  ;;  %v2102_v13 = vpop.f32.mrb[6].mxu0  ;;  %v3156_v38 = vpop.f32.mrb[6].mxu1  ;;  %v1863_v2 = vunpack.c.l.bf16 %v1979_v39 }
 0x1cf   : > { %3692 = vst [vmem:[#allocation37_spill] sm:$0xff] %v3140_v0  ;;  %v760_v25 = vmax.f32 %v652_v1, 0.0  ;;  %v655_v27 = vadd.f32 %v2102_v13, %v3124_v6  ;;  %v646_v37 = vpop.f32.mrb[7].mxu0  ;;  %v3162_v52 = vpop.f32.mrb[7].mxu1  ;;  %v915_v53 = vpack.c.bf16 %v3140_v0, %v3152_v24 }
 0x1d0   : > { %3693 = vst [vmem:[#allocation38_spill] sm:$0xff] %v3147_v10  ;;  %v758_v41 = vmax.f32 %v644_v11, 0.0  ;;  %v647_v50 = vadd.f32 %v3124_v6, %v646_v37  ;;  %v914_v51 = vpack.c.bf16 %v3147_v10, %v3145_v7 }
 0x1d1   : > { %v761_v54 = vmax.f32 %v655_v27, 0.0  ;;  %v792_v1 = vadd.f32 %v760_v25, %v3042_v28 }
 0x1d2   : > { %v790_v60 = vadd.f32 %v758_v41, %v3016_v16  ;;  %v759_v62 = vmax.f32 %v647_v50, 0.0  ;;  %2143 = vmatprep.mubr.bf16.mxu1 %v914_v51  ;;  %v1980_v41 = vld [vmem:[%s2987_s17 + $0x20] sm:$0xff]   ;;  %v692_v50 = vadd.f32 %v3124_v6, %v691_v23 }
 0x1d3   : > { %v793_v11 = vadd.f32 %v761_v54, %v3045_v29  ;;  %2144 = vmatmul.mubr.bf16.vlgmr.msra.gmra.mrb[16].mxu1 %v915_v53  ;;  %v695_v54 = vadd.f32 %v3124_v6, %v694_v40  ;;  %v1984_v16 = vld [vmem:[%s2987_s17 + $0x40] sm:$0xff]   ;;  %v1868_v10 = vunpack.c.h.bf16 %v1980_v41 }
 0x1d4   : > { %v791_v13 = vadd.f32 %v759_v62, %v3019_v17  ;;  %v2105_v37 = vpop.f32.mrb[8].mxu0  ;;  %v3175_v26 = vpop.f32.mrb[8].mxu1  ;;  %v3177_v51 = vmul.f32 %v1859_v61, %v790_v60  ;;  %v3185_v62 = vmul.f32 %v1863_v2, %v792_v1  ;;  %v1981_v60 = vld [vmem:[%s2987_s17 + $0x28] sm:$0xff]  }
 0x1d5   : > { %v3170_v5 = vmul.f32 %v1864_v59, %v793_v11  ;;  %v668_v27 = vadd.f32 %v2105_v37, %v3124_v6  ;;  %v659_v15 = vpop.f32.mrb[9].mxu0  ;;  %v3183_v59 = vpop.f32.mrb[9].mxu1  ;;  %v1872_v1 = vunpack.c.h.bf16 %v1981_v60 }
 0x1d6   : > { %3695 = vst [vmem:[#allocation40_spill] sm:$0xff] %v3177_v51  ;;  %v3179_v25 = vmul.f32 %v1860_v63, %v791_v13  ;;  %v660_v39 = vadd.f32 %v3124_v6, %v659_v15  ;;  %v2106_v53 = vpop.f32.mrb[10].mxu0  ;;  %3697 = vst [vmem:[#allocation42_spill] sm:$0xff] %v3185_v62  ;;  %v3188_v17 = vpop.f32.mrb[10].mxu1  ;;  %v1867_v63 = vunpack.c.l.bf16 %v1980_v41 }
 0x1d7   : > { %3694 = vst [vmem:[#allocation39_spill] sm:$0xff] %v3170_v5  ;;  %v764_v11 = vmax.f32 %v668_v27, 0.0  ;;  %v671_v23 = vadd.f32 %v2106_v53, %v3124_v6  ;;  %v662_v37 = vpop.f32.mrb[11].mxu0  ;;  %v3194_v13 = vpop.f32.mrb[11].mxu1  ;;  %v917_v2 = vpack.c.bf16 %v3170_v5, %v3185_v62  ;;  %v3199_v27 = vld [vmem:[%s2987_s17 + $0x38] sm:$0xff]   ;;  %v770_v53 = vmax.f32 %v692_v50, 0.0 }
 0x1d8   : > { %3696 = vst [vmem:[#allocation41_spill] sm:$0xff] %v3179_v25  ;;  %v762_v61 = vmax.f32 %v660_v39, 0.0  ;;  %v663_v15 = vadd.f32 %v3124_v6, %v662_v37  ;;  %v916_v40 = vpack.c.bf16 %v3179_v25, %v3177_v51  ;;  %v771_v37 = vmax.f32 %v695_v54, 0.0 }
 0x1d9   : > { %v765_v29 = vmax.f32 %v671_v23, 0.0  ;;  %v796_v4 = vadd.f32 %v764_v11, %v3074_v42  ;;  %v1871_v25 = vunpack.c.l.bf16 %v1981_v60  ;;  %v1879_v5 = vunpack.c.l.bf16 %v3199_v27 }
 0x1da   : > { %v794_v28 = vadd.f32 %v762_v61, %v3048_v30  ;;  %v763_v39 = vmax.f32 %v663_v15, 0.0  ;;  %2147 = vmatprep.mubr.bf16.mxu1 %v916_v40  ;;  %v1883_v62 = vunpack.c.l.bf16 %v1984_v16  ;;  %v1884_v50 = vunpack.c.h.bf16 %v1984_v16 }
 0x1db   : > { %v797_v51 = vadd.f32 %v765_v29, %v3077_v43  ;;  %2148 = vmatmul.mubr.bf16.gmra.mrb[20].mxu1 %v917_v2  ;;  %v700_v54 = vadd.f32 %v3127_v12, %v3124_v6  ;;  %v802_v11 = vadd.f32 %v770_v53, %v3002_v8  ;;  %v803_v16 = vadd.f32 %v771_v37, %v3005_v9 }
 0x1dc   : > { %v795_v23 = vadd.f32 %v763_v39, %v3051_v31  ;;  %v2109_v0 = vpop.f32.mrb[12].mxu0  ;;  %v3213_v29 = vpop.f32.mrb[12].mxu1  ;;  %v3215_v60 = vmul.f32 %v1867_v63, %v794_v28  ;;  %v1982_v39 = vld [vmem:[%s2987_s17 + $0x30] sm:$0xff]   ;;  %v708_v28 = vadd.f32 %v3124_v6, %v3150_v22  ;;  %v703_v22 = vadd.f32 %v3132_v36, %v3124_v6  ;;  %v1985_v31 = vld [vmem:[%s2987_s17 + $0x48] sm:$0xff]  }
 0x1dd   : > { %v3207_v14 = vmul.f32 %v1872_v1, %v797_v51  ;;  %v684_v41 = vadd.f32 %v2109_v0, %v3124_v6  ;;  %v675_v61 = vpop.f32.mrb[13].mxu0  ;;  %v3221_v51 = vpop.f32.mrb[13].mxu1  ;;  %v3223_v0 = vmul.f32 %v1871_v25, %v796_v4  ;;  %v711_v4 = vadd.f32 %v3124_v6, %v3162_v52 }
 0x1de   : > { %v3217_v15 = vmul.f32 %v1868_v10, %v795_v23  ;;  %v676_v40 = vadd.f32 %v3124_v6, %v675_v61  ;;  %v2110_v2 = vpop.f32.mrb[14].mxu0  ;;  %v3229_v10 = vpop.f32.mrb[14].mxu1  ;;  %v1880_v23 = vunpack.c.h.bf16 %v3199_v27  ;;  %v774_v27 = vmax.f32 %v708_v28, 0.0 }
 0x1df   : > { %3698 = vst [vmem:[#allocation43_spill] sm:$0xff] %v3207_v14  ;;  %v768_v1 = vmax.f32 %v684_v41, 0.0  ;;  %v687_v12 = vadd.f32 %v2110_v2, %v3124_v6  ;;  %v678_v8 = vpop.f32.mrb[15].mxu0  ;;  %v3236_v25 = vpop.f32.mrb[15].mxu1  ;;  %v919_v41 = vpack.c.bf16 %v3207_v14, %v3223_v0  ;;  %v3249_v30 = vmul.f32 %v1883_v62, %v802_v11 }
 0x1e0   : > { %3699 = vst [vmem:[#allocation44_spill] sm:$0xff] %v3217_v15  ;;  %v766_v63 = vmax.f32 %v676_v40, 0.0  ;;  %v679_v53 = vadd.f32 %v3124_v6, %v678_v8  ;;  %v918_v9 = vpack.c.bf16 %v3217_v15, %v3215_v60  ;;  %v1875_v40 = vunpack.c.l.bf16 %v1982_v39  ;;  %v1986_v15 = vld [vmem:[%s2987_s17 + $0x50] sm:$0xff]  }
 0x1e1   : > { %v769_v37 = vmax.f32 %v687_v12, 0.0  ;;  %v1876_v8 = vunpack.c.h.bf16 %v1982_v39  ;;  %v800_v52 = vadd.f32 %v768_v1, %v3106_v55  ;;  %v772_v12 = vmax.f32 %v700_v54, 0.0 }
 0x1e2   : > { %v798_v61 = vadd.f32 %v766_v63, %v3080_v44  ;;  %v767_v2 = vmax.f32 %v679_v53, 0.0  ;;  %2151 = vmatprep.mubr.bf16.mxu1 %v918_v9  ;;  %v3251_v14 = vmul.f32 %v1884_v50, %v803_v16  ;;  %v775_v63 = vmax.f32 %v711_v4, 0.0  ;;  %v1987_v4 = vld [vmem:[%s2987_s17 + $0x58] sm:$0xff]  }
 0x1e3   : > { %v801_v43 = vadd.f32 %v769_v37, %v3109_v56  ;;  %2152 = vmatmul.mubr.bf16.gmra.mrb[24].mxu1 %v919_v41  ;;  %v1887_v39 = vunpack.c.l.bf16 %v1985_v31  ;;  %v773_v53 = vmax.f32 %v703_v22, 0.0  ;;  %v1888_v9 = vunpack.c.h.bf16 %v1985_v31 }
 0x1e4   : > { %v799_v36 = vadd.f32 %v767_v2, %v3083_v45  ;;  %v3255_v42 = vmul.f32 %v1875_v40, %v798_v61  ;;  %v1891_v54 = vunpack.c.l.bf16 %v1986_v15  ;;  %v1892_v28 = vunpack.c.h.bf16 %v1986_v15 }
 0x1e5   : > { %v3253_v44 = vmul.f32 %v1880_v23, %v801_v43  ;;  %v3259_v37 = vmul.f32 %v1879_v5, %v800_v52  ;;  %v804_v62 = vadd.f32 %v772_v12, %v3022_v18  ;;  %v806_v50 = vadd.f32 %v774_v27, %v3028_v20 }
 0x1e6   : > { %v3257_v1 = vmul.f32 %v1876_v8, %v799_v36  ;;  %v724_v43 = vadd.f32 %v3124_v6, %v3183_v59  ;;  %v807_v11 = vadd.f32 %v775_v63, %v3031_v21  ;;  %v922_v16 = vpack.c.bf16 %v3251_v14, %v3249_v30 }
 0x1e7   : > { %v727_v5 = vadd.f32 %v3124_v6, %v3194_v13  ;;  %v805_v15 = vadd.f32 %v773_v53, %v3025_v19  ;;  %v716_v18 = vadd.f32 %v3143_v3, %v3124_v6  ;;  %v719_v20 = vadd.f32 %v3156_v38, %v3124_v6  ;;  %v1988_v13 = vld [vmem:[%s2987_s17 + $0x60] sm:$0xff]  }
 0x1e8   : > { %v920_v31 = vpack.c.bf16 %v3257_v1, %v3255_v42  ;;  %v921_v59 = vpack.c.bf16 %v3253_v44, %v3259_v37  ;;  %v778_v21 = vmax.f32 %v724_v43, 0.0  ;;  %v3280_v23 = vmul.f32 %v1891_v54, %v806_v50 }
 0x1e9   : > { %v3282_v22 = vmul.f32 %v1892_v28, %v807_v11  ;;  %v779_v19 = vmax.f32 %v727_v5, 0.0  ;;  %v3285_v41 = vmul.f32 %v1887_v39, %v804_v62  ;;  %v3287_v3 = vmul.f32 %v1888_v9, %v805_v15  ;;  %v1989_v28 = vld [vmem:[%s2987_s17 + $0x68] sm:$0xff]  }
 0x1ea   : > { %2155 = vmatprep.mubr.bf16.mxu1 %v920_v31  ;;  %v776_v61 = vmax.f32 %v716_v18, 0.0  ;;  %v777_v38 = vmax.f32 %v719_v20, 0.0  ;;  %v1895_v40 = vunpack.c.l.bf16 %v1987_v4  ;;  %v1896_v2 = vunpack.c.h.bf16 %v1987_v4 }
 0x1eb   : > { %2156 = vmatmul.mubr.bf16.gmra.mrb[28].mxu1 %v921_v59  ;;  %v732_v8 = vadd.f32 %v3175_v26, %v3124_v6  ;;  %v810_v52 = vadd.f32 %v778_v21, %v3060_v34  ;;  %v1899_v12 = vunpack.c.l.bf16 %v1988_v13  ;;  %v1900_v27 = vunpack.c.h.bf16 %v1988_v13 }
 0x1ec   : > { %2159 = vmatprep.mubr.bf16.mxu1 %v922_v16  ;;  %v811_v36 = vadd.f32 %v779_v19, %v3063_v35  ;;  %v924_v63 = vpack.c.bf16 %v3282_v22, %v3280_v23  ;;  %v740_v39 = vadd.f32 %v3124_v6, %v3221_v51  ;;  %v743_v53 = vadd.f32 %v3124_v6, %v3236_v25  ;;  %v1990_v25 = vld [vmem:[%s2987_s17 + $0x70] sm:$0xff]  }
 0x1ed   : > { %v808_v9 = vadd.f32 %v776_v61, %v3054_v32  ;;  %v809_v26 = vadd.f32 %v777_v38, %v3057_v33  ;;  %v735_v34 = vadd.f32 %v3188_v17, %v3124_v6  ;;  %v923_v54 = vpack.c.bf16 %v3287_v3, %v3285_v41 }
 0x1ee   : > { %v780_v35 = vmax.f32 %v732_v8, 0.0  ;;  %v3306_v62 = vmul.f32 %v1899_v12, %v810_v52  ;;  %v3308_v50 = vmul.f32 %v1900_v27, %v811_v36  ;;  %v782_v51 = vmax.f32 %v740_v39, 0.0  ;;  %v2352_v39 = vld [vmem:[#allocation8 + $0x20] sm:$0xff]  }
 0x1ef   : > { %v783_v43 = vmax.f32 %v743_v53, 0.0  ;;  %v3311_v31 = vmul.f32 %v1895_v40, %v808_v9  ;;  %v3313_v33 = vmul.f32 %v1896_v2, %v809_v26  ;;  %v781_v11 = vmax.f32 %v735_v34, 0.0  ;;  %v1991_v40 = vld [vmem:[%s2987_s17 + $0x78] sm:$0xff]   ;;  %2183 = vmatprep.subr.bf16.mxu0 %v2352_v39  ;;  %v3351_v9 = vld [vmem:[%s3597_s4] ss:$0 sm:$0xff] }
 0x1f0   : > { %v1903_v17 = vunpack.c.l.bf16 %v1989_v28  ;;  %v1904_v16 = vunpack.c.h.bf16 %v1989_v28  ;;  %v1907_v5 = vunpack.c.l.bf16 %v1990_v25  ;;  %v1908_v15 = vunpack.c.h.bf16 %v1990_v25  ;;  %2184 = vmatpush3.bf16.msra.mxu0 %v2352_v39  ;;  %v2355_v53 = vld [vmem:[#allocation8 + $0x38] sm:$0xff]   ;;  %v3705_v39 = vld [vmem:[#allocation25_spill] sm:$0xff] }
 0x1f1   : > { %v812_v18 = vadd.f32 %v780_v35, %v3086_v46  ;;  %v814_v20 = vadd.f32 %v782_v51, %v3092_v48  ;;  %v815_v59 = vadd.f32 %v783_v43, %v3095_v49  ;;  %v926_v4 = vpack.c.bf16 %v3308_v50, %v3306_v62 }
 0x1f2   : > { %v813_v21 = vadd.f32 %v781_v11, %v3089_v47  ;;  %v748_v13 = vadd.f32 %v3213_v29, %v3124_v6  ;;  %v751_v19 = vadd.f32 %v3229_v10, %v3124_v6  ;;  %v925_v61 = vpack.c.bf16 %v3313_v33, %v3311_v31  ;;  %v1992_v11 = vld [vmem:[%s3358_s28 + $0x8] sm:$0xff]  }
 0x1f3   : > { %2160 = vmatmul.mubr.bf16.gmra.mrb[32].mxu1 %v923_v54  ;;  %v3327_v46 = vmul.f32 %v1907_v5, %v814_v20  ;;  %v3329_v48 = vmul.f32 %v1908_v15, %v815_v59  ;;  %v3331_v49 = vmul.f32 %v1903_v17, %v812_v18  ;;  %v1911_v29 = vunpack.c.l.bf16 %v1991_v40  ;;  %v1914_v18 = vld [vmem:[%s3358_s28] sm:$0xff]  }
 0x1f4   : > { %2163 = vmatprep.mubr.bf16.mxu1 %v924_v63  ;;  %v3333_v38 = vmul.f32 %v1904_v16, %v813_v21  ;;  %v784_v47 = vmax.f32 %v748_v13, 0.0  ;;  %v785_v2 = vmax.f32 %v751_v19, 0.0  ;;  %v1912_v52 = vunpack.c.h.bf16 %v1991_v40  ;;  %v3701_v19 = vld [vmem:[#allocation37_spill] sm:$0xff]  ;;  %v3702_v40 = vld [vmem:[#allocation24_spill] sm:$0xff] }
 0x1f5   : > { %v928_v6 = vpack.c.bf16 %v3329_v48, %v3327_v46  ;;  %v1919_v13 = vunpack.c.l.bf16 %v1992_v11 }
 0x1f6   : > { %v816_v10 = vadd.f32 %v784_v47, %v3112_v57  ;;  %v817_v8 = vadd.f32 %v785_v2, %v3115_v58  ;;  %v927_v12 = vpack.c.bf16 %v3333_v38, %v3331_v49  ;;  %v2353_v57 = vld [vmem:[#allocation8 + $0x28] sm:$0xff]   ;;  %v2354_v58 = vld [vmem:[#allocation8 + $0x30] sm:$0xff]   ;;  %v1920_v47 = vunpack.c.h.bf16 %v1992_v11 }
 0x1f7   : > { %2185 = vmatprep.subr.bf16.mxu0 %v2353_v57 }
 0x1f8   : > { %v3342_v27 = vmul.f32 %v1911_v29, %v816_v10  ;;  %v3344_v36 = vmul.f32 %v1912_v52, %v817_v8  ;;  %2186 = vmatpush3.bf16.msra.mxu0 %v2353_v57  ;;  %v3703_v29 = vld [vmem:[#allocation38_spill] sm:$0xff]  ;;  %v1915_v8 = vunpack.c.l.bf16 %v1914_v18  ;;  %v1916_v52 = vunpack.c.h.bf16 %v1914_v18 }
 0x1f9   : > { %2187 = vmatprep.subr.bf16.mxu0 %v2354_v58 }
 0x1fa   : > { %v929_v63 = vpack.c.bf16 %v3344_v36, %v3342_v27 }
 0x1fb   : > { %2164 = vmatmul.mubr.bf16.gmra.mrb[36].mxu1 %v925_v61 }
 0x1fc   : > { %2167 = vmatprep.mubr.bf16.mxu1 %v926_v4  ;;  %2188 = vmatpush3.bf16.msra.mxu0 %v2354_v58  ;;  %v3700_v4 = vld [vmem:[#allocation26_spill] sm:$0xff] }
 0x1fd   : > { %2189 = vmatprep.subr.bf16.mxu0 %v2355_v53 }
 0x200   : > { %2190 = vmatpush3.bf16.msra.mxu0 %v2355_v53 }
 0x203   : > { %2168 = vmatmul.mubr.bf16.gmra.mrb[40].mxu1 %v927_v12  ;;  %v3704_v12 = vld [vmem:[#allocation27_spill] sm:$0xff] }
 0x204   : > { %2171 = vmatprep.mubr.bf16.mxu1 %v928_v6 }
 0x20b   : > { %2172 = vmatmul.mubr.bf16.gmra.mrb[44].mxu1 %v929_v63 }
 0x2a6   : > { %v2145_v26 = vpop.f32.mrb[16].mxu1 }
 0x2a7   : > { %v1044_v34 = vadd.f32 %v2145_v26, %v3351_v9  ;;  %v1035_v54 = vpop.f32.mrb[17].mxu1 }
 0x2a8   : > { %v1036_v35 = vadd.f32 %v3351_v9, %v1035_v54  ;;  %v2146_v28 = vpop.f32.mrb[18].mxu1 }
 0x2a9   : > { %v1164_v51 = vmax.f32 %v1044_v34, 0.0  ;;  %v1047_v25 = vadd.f32 %v2146_v28, %v3351_v9  ;;  %v1038_v43 = vpop.f32.mrb[19].mxu1 }
 0x2aa   : > { %v1162_v17 = vmax.f32 %v1036_v35, 0.0  ;;  %v1039_v16 = vadd.f32 %v3351_v9, %v1038_v43 }
 0x2ab   : > { %v1196_v5 = vadd.f32 %v1164_v51, %v3152_v24  ;;  %v1165_v15 = vmax.f32 %v1047_v25, 0.0 }
 0x2ac   : > { %v1194_v20 = vadd.f32 %v1162_v17, %v3145_v7  ;;  %v1163_v59 = vmax.f32 %v1039_v16, 0.0  ;;  %v1994_v17 = vld [vmem:[%s3358_s28 + $0x18] sm:$0xff]  }
 0x2ad   : > { %v1228_v21 = vadd.f32 %v1196_v5, %v3700_v4  ;;  %v1197_v61 = vadd.f32 %v1165_v15, %v3701_v19  ;;  %v3706_v5 = vld [vmem:[#allocation42_spill] sm:$0xff] }
 0x2ae   : > { %v1226_v2 = vadd.f32 %v1194_v20, %v3702_v40  ;;  %v1195_v6 = vadd.f32 %v1163_v59, %v3703_v29  ;;  %v2149_v10 = vpop.f32.mrb[20].mxu1  ;;  %v1993_v20 = vld [vmem:[%s3358_s28 + $0x10] sm:$0xff]   ;;  %v3707_v59 = vld [vmem:[#allocation40_spill] sm:$0xff]  ;;  %v1927_v29 = vunpack.c.l.bf16 %v1994_v17 }
 0x2af   : > { %v1229_v24 = vadd.f32 %v1197_v61, %v3704_v12  ;;  %v1060_v63 = vadd.f32 %v2149_v10, %v3351_v9  ;;  %v1051_v7 = vpop.f32.mrb[21].mxu1  ;;  %v1324_v26 = vmul.f32 %v1919_v13, %v1228_v21  ;;  %v3708_v13 = vld [vmem:[#allocation30_spill] sm:$0xff]  ;;  %v3710_v10 = vld [vmem:[#allocation28_spill] sm:$0xff] }
 0x2b0   : > { %v1227_v57 = vadd.f32 %v1195_v6, %v3705_v39  ;;  %v1052_v58 = vadd.f32 %v3351_v9, %v1051_v7  ;;  %v2150_v53 = vpop.f32.mrb[22].mxu1  ;;  %v1322_v43 = vmul.f32 %v1915_v8, %v1226_v2  ;;  %v1928_v6 = vunpack.c.h.bf16 %v1994_v17  ;;  %v3711_v2 = vld [vmem:[#allocation41_spill] sm:$0xff]  ;;  %v3712_v7 = vld [vmem:[#allocation31_spill] sm:$0xff] }
 0x2b1   : > { %v1325_v34 = vmul.f32 %v1920_v47, %v1229_v24  ;;  %v1168_v54 = vmax.f32 %v1060_v63, 0.0  ;;  %v1063_v35 = vadd.f32 %v2150_v53, %v3351_v9  ;;  %v1054_v28 = vpop.f32.mrb[23].mxu1  ;;  %v3709_v47 = vld [vmem:[#allocation39_spill] sm:$0xff]  ;;  %v1923_v24 = vunpack.c.l.bf16 %v1993_v20  ;;  %v3713_v53 = vld [vmem:[#allocation29_spill] sm:$0xff] }
 0x2b2   : > { %v1166_v51 = vmax.f32 %v1052_v58, 0.0  ;;  %v1055_v25 = vadd.f32 %v3351_v9, %v1054_v28  ;;  %v1323_v11 = vmul.f32 %v1916_v52, %v1227_v57  ;;  %v1924_v63 = vunpack.c.h.bf16 %v1993_v20 }
 0x2b3   : > { %v1355_v16 = vpack.c.bf16 %v1325_v34, %v1324_v26  ;;  %v1200_v15 = vadd.f32 %v1168_v54, %v3706_v5  ;;  %v1169_v18 = vmax.f32 %v1063_v35, 0.0 }
 0x2b4   : > { %v1198_v4 = vadd.f32 %v1166_v51, %v3707_v59  ;;  %v1167_v19 = vmax.f32 %v1055_v25, 0.0  ;;  %v1354_v21 = vpack.c.bf16 %v1323_v11, %v1322_v43 }
 0x2b5   : > { %v1232_v61 = vadd.f32 %v1200_v15, %v3708_v13  ;;  %v1201_v40 = vadd.f32 %v1169_v18, %v3709_v47  ;;  %v1996_v18 = vld [vmem:[%s3358_s28 + $0x28] sm:$0xff]   ;;  %v3714_v47 = vld [vmem:[#allocation34_spill] sm:$0xff] }
 0x2b6   : > { %v1230_v12 = vadd.f32 %v1198_v4, %v3710_v10  ;;  %v1199_v8 = vadd.f32 %v1167_v19, %v3711_v2  ;;  %v2153_v52 = vpop.f32.mrb[24].mxu1  ;;  %2191 = vmatprep.mubr.bf16.mxu0 %v1354_v21  ;;  %v1995_v4 = vld [vmem:[%s3358_s28 + $0x20] sm:$0xff]   ;;  %v3715_v10 = vld [vmem:[#allocation43_spill] sm:$0xff] }
 0x2b7   : > { %v1233_v39 = vadd.f32 %v1201_v40, %v3712_v7  ;;  %v1076_v57 = vadd.f32 %v2153_v52, %v3351_v9  ;;  %v1067_v58 = vpop.f32.mrb[25].mxu1  ;;  %2192 = vmatmul.mubr.bf16.vlgmr.msra.gmra.mrb[16].mxu0 %v1355_v16  ;;  %v1328_v25 = vmul.f32 %v1927_v29, %v1232_v61  ;;  %v1935_v29 = vunpack.c.l.bf16 %v1996_v18  ;;  %v3716_v2 = vld [vmem:[#allocation32_spill] sm:$0xff]  ;;  %v3718_v7 = vld [vmem:[#allocation35_spill] sm:$0xff] }
 0x2b8   : > { %v1231_v26 = vadd.f32 %v1199_v8, %v3713_v53  ;;  %v1068_v34 = vadd.f32 %v3351_v9, %v1067_v58  ;;  %v2154_v54 = vpop.f32.mrb[26].mxu1  ;;  %v1326_v5 = vmul.f32 %v1923_v24, %v1230_v12  ;;  %v3717_v12 = vld [vmem:[#allocation44_spill] sm:$0xff]  ;;  %v3719_v58 = vld [vmem:[#allocation33_spill] sm:$0xff] }
 0x2b9   : > { %v1172_v35 = vmax.f32 %v1076_v57, 0.0  ;;  %v1079_v28 = vadd.f32 %v2154_v54, %v3351_v9  ;;  %v1070_v51 = vpop.f32.mrb[27].mxu1  ;;  %v1329_v43 = vmul.f32 %v1928_v6, %v1233_v39  ;;  %v1936_v6 = vunpack.c.h.bf16 %v1996_v18 }
 0x2ba   : > { %v1170_v11 = vmax.f32 %v1068_v34, 0.0  ;;  %v1071_v17 = vadd.f32 %v3351_v9, %v1070_v51  ;;  %v1327_v15 = vmul.f32 %v1924_v63, %v1231_v26  ;;  %v1932_v63 = vunpack.c.h.bf16 %v1995_v4 }
 0x2bb   : > { %v1204_v16 = vadd.f32 %v1172_v35, %v3223_v0  ;;  %v1173_v20 = vmax.f32 %v1079_v28, 0.0  ;;  %v1357_v59 = vpack.c.bf16 %v1329_v43, %v1328_v25  ;;  %v1931_v0 = vunpack.c.l.bf16 %v1995_v4 }
 0x2bc   : > { %v1202_v19 = vadd.f32 %v1170_v11, %v3215_v60  ;;  %v1171_v21 = vmax.f32 %v1071_v17, 0.0  ;;  %v1356_v13 = vpack.c.bf16 %v1327_v15, %v1326_v5  ;;  %v1998_v15 = vld [vmem:[%s3358_s28 + $0x38] sm:$0xff]  }
 0x2bd   : > { %v1236_v40 = vadd.f32 %v1204_v16, %v3714_v47  ;;  %v1205_v61 = vadd.f32 %v1173_v20, %v3715_v10  ;;  %v1944_v10 = vunpack.c.h.bf16 %v1998_v15 }
 0x2be   : > { %v1234_v8 = vadd.f32 %v1202_v19, %v3716_v2  ;;  %v1203_v52 = vadd.f32 %v1171_v21, %v3717_v12  ;;  %v2157_v24 = vpop.f32.mrb[28].mxu1  ;;  %2195 = vmatprep.mubr.bf16.mxu0 %v1356_v13 }
 0x2bf   : > { %v1237_v39 = vadd.f32 %v1205_v61, %v3718_v7  ;;  %v1092_v60 = vadd.f32 %v2157_v24, %v3351_v9  ;;  %v1083_v57 = vpop.f32.mrb[29].mxu1  ;;  %2196 = vmatmul.mubr.bf16.gmra.mrb[20].mxu0 %v1357_v59  ;;  %v1332_v51 = vmul.f32 %v1935_v29, %v1236_v40  ;;  %v1997_v59 = vld [vmem:[%s3358_s28 + $0x30] sm:$0xff]   ;;  %v1943_v40 = vunpack.c.l.bf16 %v1998_v15  ;;  %v3720_v61 = vld [vmem:[#allocation36_spill] sm:$0xff] }
 0x2c0   : > { %v1235_v53 = vadd.f32 %v1203_v52, %v3719_v58  ;;  %v1084_v26 = vadd.f32 %v3351_v9, %v1083_v57  ;;  %v2158_v34 = vpop.f32.mrb[30].mxu1  ;;  %v1330_v17 = vmul.f32 %v1931_v0, %v1234_v8  ;;  %v1940_v8 = vunpack.c.h.bf16 %v1997_v59  ;;  %v2357_v15 = vld [vmem:[%s2970_s7 + $0x80] sm:$0xff] }
 0x2c1   : > { %v1176_v54 = vmax.f32 %v1092_v60, 0.0  ;;  %v1095_v35 = vadd.f32 %v2158_v34, %v3351_v9  ;;  %v1086_v28 = vpop.f32.mrb[31].mxu1  ;;  %v1333_v25 = vmul.f32 %v1936_v6, %v1237_v39 }
 0x2c2   : > { %v1174_v43 = vmax.f32 %v1084_v26, 0.0  ;;  %v1087_v11 = vadd.f32 %v3351_v9, %v1086_v28  ;;  %v1331_v5 = vmul.f32 %v1932_v63, %v1235_v53  ;;  %v2000_v53 = vld [vmem:[%s3358_s28 + $0x48] sm:$0xff]  }
 0x2c3   : > { %v1208_v18 = vadd.f32 %v1176_v54, %v3259_v37  ;;  %v1177_v16 = vmax.f32 %v1095_v35, 0.0  ;;  %v1359_v20 = vpack.c.bf16 %v1333_v25, %v1332_v51  ;;  %v1939_v37 = vunpack.c.l.bf16 %v1997_v59  ;;  %v1999_v54 = vld [vmem:[%s3358_s28 + $0x40] sm:$0xff]   ;;  %v2356_v25 = vld [vmem:[%s2970_s7 + $0x90] sm:$0xff] }
 0x2c4   : > { %v1206_v4 = vadd.f32 %v1174_v43, %v3255_v42  ;;  %v1175_v19 = vmax.f32 %v1087_v11, 0.0  ;;  %v1358_v21 = vpack.c.bf16 %v1331_v5, %v1330_v17  ;;  %v1951_v17 = vunpack.c.l.bf16 %v2000_v53 }
 0x2c5   : > { %v1240_v13 = vadd.f32 %v1208_v18, %v3106_v55  ;;  %v1209_v47 = vadd.f32 %v1177_v16, %v3253_v44  ;;  %v1952_v5 = vunpack.c.h.bf16 %v2000_v53  ;;  %v1948_v59 = vunpack.c.h.bf16 %v1999_v54 }
 0x2c6   : > { %v1238_v29 = vadd.f32 %v1206_v4, %v3720_v61  ;;  %v1207_v6 = vadd.f32 %v1175_v19, %v3257_v1  ;;  %v2161_v2 = vpop.f32.mrb[32].mxu1  ;;  %2199 = vmatprep.mubr.bf16.mxu0 %v1358_v21  ;;  %v2358_v4 = vld [vmem:[%s2970_s7 + $0x98] sm:$0xff] }
 0x2c7   : > { %v1241_v12 = vadd.f32 %v1209_v47, %v3109_v56  ;;  %v1108_v42 = vadd.f32 %v2161_v2, %v3351_v9  ;;  %v1099_v52 = vpop.f32.mrb[33].mxu1  ;;  %2200 = vmatmul.mubr.bf16.gmra.mrb[24].mxu0 %v1359_v20  ;;  %v1336_v7 = vmul.f32 %v1943_v40, %v1240_v13  ;;  %v1947_v20 = vunpack.c.l.bf16 %v1999_v54  ;;  %v2359_v13 = vld [vmem:[%s2970_s7 + $0x88] sm:$0xff] }
 0x2c8   : > { %v1239_v55 = vadd.f32 %v1207_v6, %v3083_v45  ;;  %v1100_v44 = vadd.f32 %v3351_v9, %v1099_v52  ;;  %v2162_v24 = vpop.f32.mrb[34].mxu1  ;;  %v1334_v57 = vmul.f32 %v1939_v37, %v1238_v29 }
 0x2c9   : > { %v1180_v0 = vmax.f32 %v1108_v42, 0.0  ;;  %v1111_v1 = vadd.f32 %v2162_v24, %v3351_v9  ;;  %v1102_v63 = vpop.f32.mrb[35].mxu1  ;;  %v1337_v39 = vmul.f32 %v1944_v10, %v1241_v12  ;;  %v2002_v42 = vld [vmem:[%s3358_s28 + $0x58] sm:$0xff]   ;;  %v2001_v24 = vld [vmem:[%s3358_s28 + $0x50] sm:$0xff]  }
 0x2ca   : > { %v1178_v60 = vmax.f32 %v1100_v44, 0.0  ;;  %v1103_v56 = vadd.f32 %v3351_v9, %v1102_v63  ;;  %v1335_v58 = vmul.f32 %v1940_v8, %v1239_v55 }
 0x2cb   : > { %v1212_v45 = vadd.f32 %v1180_v0, %v3285_v41  ;;  %v1181_v26 = vmax.f32 %v1111_v1, 0.0  ;;  %v1361_v34 = vpack.c.bf16 %v1337_v39, %v1336_v7 }
 0x2cc   : > { %v1210_v35 = vadd.f32 %v1178_v60, %v3249_v30  ;;  %v1179_v28 = vmax.f32 %v1103_v56, 0.0  ;;  %v1360_v51 = vpack.c.bf16 %v1335_v58, %v1334_v57  ;;  %v1959_v60 = vunpack.c.l.bf16 %v2002_v42  ;;  %v2360_v57 = vld [vmem:[%s2970_s7 + $0xa0] sm:$0xff] }
 0x2cd   : > { %v1244_v43 = vadd.f32 %v2356_v25, %v1212_v45  ;;  %v1213_v11 = vadd.f32 %v1181_v26, %v3287_v3  ;;  %v1960_v56 = vunpack.c.h.bf16 %v2002_v42  ;;  %v1955_v45 = vunpack.c.l.bf16 %v2001_v24 }
 0x2ce   : > { %v1242_v18 = vadd.f32 %v2357_v15, %v1210_v35  ;;  %v1211_v16 = vadd.f32 %v1179_v28, %v3251_v14  ;;  %v2165_v41 = vpop.f32.mrb[36].mxu1  ;;  %2203 = vmatprep.mubr.bf16.mxu0 %v1360_v51  ;;  %v1956_v26 = vunpack.c.h.bf16 %v2001_v24 }
 0x2cf   : > { %v1245_v19 = vadd.f32 %v2358_v4, %v1213_v11  ;;  %v1124_v30 = vadd.f32 %v2165_v41, %v3351_v9  ;;  %v1115_v21 = vpop.f32.mrb[37].mxu1  ;;  %2204 = vmatmul.mubr.bf16.gmra.mrb[28].mxu0 %v1361_v34  ;;  %v1340_v29 = vmul.f32 %v1951_v17, %v1244_v43  ;;  %v2361_v34 = vld [vmem:[%s2970_s7 + $0xb8] sm:$0xff]  ;;  %v2004_v41 = vld [vmem:[%s3358_s28 + $0x68] sm:$0xff]  }
 0x2d0   : > { %v1243_v47 = vadd.f32 %v2359_v13, %v1211_v16  ;;  %v1116_v3 = vadd.f32 %v3351_v9, %v1115_v21  ;;  %v2166_v40 = vpop.f32.mrb[38].mxu1  ;;  %v1338_v8 = vmul.f32 %v1947_v20, %v1242_v18 }
 0x2d1   : > { %v1184_v10 = vmax.f32 %v1124_v30, 0.0  ;;  %v1127_v14 = vadd.f32 %v2166_v40, %v3351_v9  ;;  %v1118_v61 = vpop.f32.mrb[39].mxu1  ;;  %v1341_v6 = vmul.f32 %v1952_v5, %v1245_v19  ;;  %v2003_v19 = vld [vmem:[%s3358_s28 + $0x60] sm:$0xff]  }
 0x2d2   : > { %v1182_v2 = vmax.f32 %v1116_v3, 0.0  ;;  %v1119_v37 = vadd.f32 %v3351_v9, %v1118_v61  ;;  %v1339_v12 = vmul.f32 %v1948_v59, %v1243_v47  ;;  %v2363_v47 = vld [vmem:[%s2970_s7 + $0xd0] sm:$0xff]  ;;  %v2364_v61 = vld [vmem:[%s2970_s7 + $0xc0] sm:$0xff] }
 0x2d3   : > { %v1216_v52 = vadd.f32 %v1184_v10, %v3311_v31  ;;  %v1185_v55 = vmax.f32 %v1127_v14, 0.0  ;;  %v1363_v44 = vpack.c.bf16 %v1341_v6, %v1340_v29  ;;  %v1967_v10 = vunpack.c.l.bf16 %v2004_v41 }
 0x2d4   : > { %v1214_v0 = vadd.f32 %v1182_v2, %v3280_v23  ;;  %v1183_v1 = vmax.f32 %v1119_v37, 0.0  ;;  %v1362_v63 = vpack.c.bf16 %v1339_v12, %v1338_v8  ;;  %v1968_v14 = vunpack.c.h.bf16 %v2004_v41  ;;  %v2365_v8 = vld [vmem:[%s2970_s7 + $0xd8] sm:$0xff] }
 0x2d5   : > { %v1248_v7 = vadd.f32 %v1216_v52, %v3054_v32  ;;  %v1217_v39 = vadd.f32 %v1185_v55, %v3313_v33  ;;  %v2362_v32 = vld [vmem:[%s2970_s7 + $0xa8] sm:$0xff]  ;;  %v1963_v2 = vunpack.c.l.bf16 %v2003_v19  ;;  %v1964_v37 = vunpack.c.h.bf16 %v2003_v19 }
 0x2d6   : > { %v1246_v58 = vadd.f32 %v2360_v57, %v1214_v0  ;;  %v1215_v53 = vadd.f32 %v1183_v1, %v3282_v22  ;;  %v2169_v31 = vpop.f32.mrb[40].mxu1  ;;  %2207 = vmatprep.mubr.bf16.mxu0 %v1362_v63  ;;  %v2366_v52 = vld [vmem:[%s2970_s7 + $0xc8] sm:$0xff]  ;;  %v2006_v57 = vld [vmem:[%s3358_s28 + $0x78] sm:$0xff]  }
 0x2d7   : > { %v1249_v54 = vadd.f32 %v2361_v34, %v1217_v39  ;;  %v1140_v23 = vadd.f32 %v2169_v31, %v3351_v9  ;;  %v1131_v35 = vpop.f32.mrb[41].mxu1  ;;  %2208 = vmatmul.mubr.bf16.gmra.mrb[32].mxu0 %v1363_v44  ;;  %v1344_v11 = vmul.f32 %v1959_v60, %v1248_v7 }
 0x2d8   : > { %v1247_v28 = vadd.f32 %v2362_v32, %v1215_v53  ;;  %v1132_v33 = vadd.f32 %v3351_v9, %v1131_v35  ;;  %v2170_v51 = vpop.f32.mrb[42].mxu1  ;;  %v1342_v18 = vmul.f32 %v1955_v45, %v1246_v58  ;;  %v2005_v45 = vld [vmem:[%s3358_s28 + $0x70] sm:$0xff]  }
 0x2d9   : > { %v1188_v25 = vmax.f32 %v1140_v23, 0.0  ;;  %v1143_v22 = vadd.f32 %v2170_v51, %v3351_v9  ;;  %v1134_v43 = vpop.f32.mrb[43].mxu1  ;;  %v1345_v17 = vmul.f32 %v1960_v56, %v1249_v54  ;;  %v2367_v23 = vld [vmem:[%s2970_s7 + $0xf0] sm:$0xff] }
 0x2da   : > { %v1186_v5 = vmax.f32 %v1132_v33, 0.0  ;;  %v1135_v15 = vadd.f32 %v3351_v9, %v1134_v43  ;;  %v1343_v16 = vmul.f32 %v1956_v26, %v1247_v28  ;;  %v1976_v28 = vunpack.c.h.bf16 %v2006_v57  ;;  %v2368_v33 = vld [vmem:[%s2970_s7 + $0xe0] sm:$0xff]  ;;  %v2369_v43 = vld [vmem:[%s2970_s7 + $0xf8] sm:$0xff] }
 0x2db   : > { %v1220_v20 = vadd.f32 %v1188_v25, %v3331_v49  ;;  %v1189_v59 = vmax.f32 %v1143_v22, 0.0  ;;  %v1365_v4 = vpack.c.bf16 %v1345_v17, %v1344_v11  ;;  %v1972_v22 = vunpack.c.h.bf16 %v2005_v45 }
 0x2dc   : > { %v1218_v30 = vadd.f32 %v1186_v5, %v3306_v62  ;;  %v1187_v21 = vmax.f32 %v1135_v15, 0.0  ;;  %v1364_v13 = vpack.c.bf16 %v1343_v16, %v1342_v18 }
 0x2dd   : > { %v1252_v3 = vadd.f32 %v2363_v47, %v1220_v20  ;;  %v1221_v40 = vadd.f32 %v1189_v59, %v3333_v38 }
 0x2de   : > { %v1250_v29 = vadd.f32 %v2364_v61, %v1218_v30  ;;  %v1219_v6 = vadd.f32 %v1187_v21, %v3308_v50  ;;  %v2173_v49 = vpop.f32.mrb[44].mxu1  ;;  %2211 = vmatprep.mubr.bf16.mxu0 %v1364_v13 }
 0x2df   : > { %v1253_v12 = vadd.f32 %v2365_v8, %v1221_v40  ;;  %v1156_v62 = vadd.f32 %v2173_v49, %v3351_v9  ;;  %v1147_v42 = vpop.f32.mrb[45].mxu1  ;;  %2212 = vmatmul.mubr.bf16.gmra.mrb[36].mxu0 %v1365_v4  ;;  %v1348_v1 = vmul.f32 %v1967_v10, %v1252_v3 }
 0x2e0   : > { %v1251_v55 = vadd.f32 %v2366_v52, %v1219_v6  ;;  %v1148_v38 = vadd.f32 %v3351_v9, %v1147_v42  ;;  %v2174_v44 = vpop.f32.mrb[46].mxu1  ;;  %v1346_v60 = vmul.f32 %v1963_v2, %v1250_v29 }
 0x2e1   : > { %v1192_v24 = vmax.f32 %v1156_v62, 0.0  ;;  %v1159_v50 = vadd.f32 %v2174_v44, %v3351_v9  ;;  %v1150_v0 = vpop.f32.mrb[47].mxu1  ;;  %v1349_v63 = vmul.f32 %v1968_v14, %v1253_v12 }
 0x2e2   : > { %v1190_v7 = vmax.f32 %v1148_v38, 0.0  ;;  %v1151_v39 = vadd.f32 %v3351_v9, %v1150_v0  ;;  %v1347_v56 = vmul.f32 %v1964_v37, %v1251_v55  ;;  %v1975_v9 = vunpack.c.l.bf16 %v2006_v57 }
 0x2e3   : > { %v1224_v58 = vadd.f32 %v1192_v24, %v3342_v27  ;;  %v1193_v53 = vmax.f32 %v1159_v50, 0.0  ;;  %v1367_v31 = vpack.c.bf16 %v1349_v63, %v1348_v1  ;;  %v1971_v27 = vunpack.c.l.bf16 %v2005_v45 }
 0x2e4   : > { %v1222_v26 = vadd.f32 %v1190_v7, %v3327_v46  ;;  %v1191_v34 = vmax.f32 %v1151_v39, 0.0  ;;  %v1366_v54 = vpack.c.bf16 %v1347_v56, %v1346_v60  ;;  %v2370_v46 = vld [vmem:[%s2970_s7 + $0xe8] sm:$0xff]  ;;  %s2551_s7 = scalar_lea.vmem %s2550_s26, 8192 }
 0x2e5   : > { %v1256_v35 = vadd.f32 %v2367_v23, %v1224_v58  ;;  %v1225_v32 = vadd.f32 %v1193_v53, %v3344_v36  ;;  %p2553_p5 = scmp.lt.s32.totalorder %s2551_s7, %s2545_s29 }
 0x2e6   : > { %v1254_v51 = vadd.f32 %v2368_v33, %v1222_v26  ;;  %v1223_v25 = vadd.f32 %v1191_v34, %v3329_v48  ;;  %2215 = vmatprep.mubr.bf16.mxu0 %v1366_v54  ;;  %v3472_v48 = vld [vmem:[%s3721_s15] ss:$0 sm:$0xff] }
 0x2e7   : > { %v1257_v11 = vadd.f32 %v2369_v43, %v1225_v32  ;;  %2216 = vmatmul.mubr.bf16.gmra.mrb[40].mxu0 %v1367_v31  ;;  %v1352_v5 = vmul.f32 %v1975_v9, %v1256_v35  ;;  %p2554_p10 = por %p2553_p5, %p2552_p8 }
 0x2e8   : > { %v1255_v17 = vadd.f32 %v2370_v46, %v1223_v25  ;;  %v1350_v18 = vmul.f32 %v1971_v27, %v1254_v51 }
 0x2e9   : > { %v1353_v15 = vmul.f32 %v1976_v28, %v1257_v11  ;;  %p2555_p6 = pnand %p2554_p10, %p2548_p11 }
 0x2ea   : > { %v1351_v16 = vmul.f32 %v1972_v22, %v1255_v17 }
 0x2eb   : > { %v1369_v36 = vpack.c.bf16 %v1353_v15, %v1352_v5 }
 0x2ec   : > { %v1368_v41 = vpack.c.bf16 %v1351_v16, %v1350_v18 }
 0x2ee   : > { %2219 = vmatprep.mubr.bf16.mxu0 %v1368_v41 }
 0x2ef   : > { %2220 = vmatmul.mubr.bf16.gmra.mrb[44].mxu0 %v1369_v36 }
 0x38a   : > { %v2193_v20 = vpop.f32.mrb[16].mxu0 }
 0x38b   : > { %v1484_v59 = vadd.f32 %v2193_v20, %v3472_v48  ;;  %v1475_v4 = vpop.f32.mrb[17].mxu0 }
 0x38c   : > { %v1476_v19 = vadd.f32 %v3472_v48, %v1475_v4  ;;  %v2194_v30 = vpop.f32.mrb[18].mxu0 }
 0x38d   : > { %1604 = vst [vmem:[%s3478_s9 + $0x10] sm:$0xff] %v1484_v59  ;;  %v1487_v21 = vadd.f32 %v2194_v30, %v3472_v48  ;;  %v1478_v13 = vpop.f32.mrb[19].mxu0 }
 0x38e   : > { %1602 = vst [vmem:[%s3478_s9] sm:$0xff] %v1476_v19  ;;  %v1479_v47 = vadd.f32 %v3472_v48, %v1478_v13 }
 0x38f   : > { %1605 = vst [vmem:[%s3478_s9 + $0x18] sm:$0xff] %v1487_v21 }
 0x390   : > { %1603 = vst [vmem:[%s3478_s9 + $0x8] sm:$0xff] %v1479_v47 }
 0x392   : > { %v2197_v3 = vpop.f32.mrb[20].mxu0 }
 0x393   : > { %v1500_v40 = vadd.f32 %v2197_v3, %v3472_v48  ;;  %v1491_v10 = vpop.f32.mrb[21].mxu0 }
 0x394   : > { %v1492_v14 = vadd.f32 %v3472_v48, %v1491_v10  ;;  %v2198_v61 = vpop.f32.mrb[22].mxu0 }
 0x395   : > { %1608 = vst [vmem:[%s3478_s9 + $0x30] sm:$0xff] %v1500_v40  ;;  %v1503_v29 = vadd.f32 %v2198_v61, %v3472_v48  ;;  %v1494_v6 = vpop.f32.mrb[23].mxu0 }
 0x396   : > { %1606 = vst [vmem:[%s3478_s9 + $0x20] sm:$0xff] %v1492_v14  ;;  %v1495_v49 = vadd.f32 %v3472_v48, %v1494_v6 }
 0x397   : > { %1609 = vst [vmem:[%s3478_s9 + $0x38] sm:$0xff] %v1503_v29 }
 0x398   : > { %1607 = vst [vmem:[%s3478_s9 + $0x28] sm:$0xff] %v1495_v49 }
 0x39a   : > { %v2201_v2 = vpop.f32.mrb[24].mxu0 }
 0x39b   : > { %v1516_v37 = vadd.f32 %v2201_v2, %v3472_v48  ;;  %v1507_v8 = vpop.f32.mrb[25].mxu0 }
 0x39c   : > { %v1508_v12 = vadd.f32 %v3472_v48, %v1507_v8  ;;  %v2202_v62 = vpop.f32.mrb[26].mxu0 }
 0x39d   : > { %1612 = vst [vmem:[%s3478_s9 + $0x50] sm:$0xff] %v1516_v37  ;;  %v1519_v42 = vadd.f32 %v2202_v62, %v3472_v48  ;;  %v1510_v52 = vpop.f32.mrb[27].mxu0 }
 0x39e   : > { %1610 = vst [vmem:[%s3478_s9 + $0x40] sm:$0xff] %v1508_v12  ;;  %v1511_v55 = vadd.f32 %v3472_v48, %v1510_v52 }
 0x39f   : > { %1613 = vst [vmem:[%s3478_s9 + $0x58] sm:$0xff] %v1519_v42 }
 0x3a0   : > { %1611 = vst [vmem:[%s3478_s9 + $0x48] sm:$0xff] %v1511_v55 }
 0x3a2   : > { %v2205_v38 = vpop.f32.mrb[28].mxu0 }
 0x3a3   : > { %v1532_v44 = vadd.f32 %v2205_v38, %v3472_v48  ;;  %v1523_v24 = vpop.f32.mrb[29].mxu0 }
 0x3a4   : > { %v1524_v50 = vadd.f32 %v3472_v48, %v1523_v24  ;;  %v2206_v0 = vpop.f32.mrb[30].mxu0 }
 0x3a5   : > { %1616 = vst [vmem:[%s3478_s9 + $0x70] sm:$0xff] %v1532_v44  ;;  %v1535_v1 = vadd.f32 %v2206_v0, %v3472_v48  ;;  %v1526_v63 = vpop.f32.mrb[31].mxu0 }
 0x3a6   : > { %1614 = vst [vmem:[%s3478_s9 + $0x60] sm:$0xff] %v1524_v50  ;;  %v1527_v7 = vadd.f32 %v3472_v48, %v1526_v63 }
 0x3a7   : > { %1617 = vst [vmem:[%s3478_s9 + $0x78] sm:$0xff] %v1535_v1 }
 0x3a8   : > { %1615 = vst [vmem:[%s3478_s9 + $0x68] sm:$0xff] %v1527_v7 }
 0x3aa   : > { %v2209_v39 = vpop.f32.mrb[32].mxu0 }
 0x3ab   : > { %v1548_v60 = vadd.f32 %v2209_v39, %v3472_v48  ;;  %v1539_v56 = vpop.f32.mrb[33].mxu0 }
 0x3ac   : > { %v1540_v57 = vadd.f32 %v3472_v48, %v1539_v56  ;;  %v2210_v58 = vpop.f32.mrb[34].mxu0 }
 0x3ad   : > { %1620 = vst [vmem:[%s3478_s9 + $0x90] sm:$0xff] %v1548_v60  ;;  %v1551_v53 = vadd.f32 %v2210_v58, %v3472_v48  ;;  %v1542_v31 = vpop.f32.mrb[35].mxu0 }
 0x3ae   : > { %1618 = vst [vmem:[%s3478_s9 + $0x80] sm:$0xff] %v1540_v57  ;;  %v1543_v45 = vadd.f32 %v3472_v48, %v1542_v31 }
 0x3af   : > { %1621 = vst [vmem:[%s3478_s9 + $0x98] sm:$0xff] %v1551_v53 }
 0x3b0   : > { %1619 = vst [vmem:[%s3478_s9 + $0x88] sm:$0xff] %v1543_v45 }
 0x3b2   : > { %v2213_v26 = vpop.f32.mrb[36].mxu0 }
 0x3b3   : > { %v1564_v34 = vadd.f32 %v2213_v26, %v3472_v48  ;;  %v1555_v54 = vpop.f32.mrb[37].mxu0 }
 0x3b4   : > { %v1556_v23 = vadd.f32 %v3472_v48, %v1555_v54  ;;  %v2214_v35 = vpop.f32.mrb[38].mxu0 }
 0x3b5   : > { %1624 = vst [vmem:[%s3478_s9 + $0xb0] sm:$0xff] %v1564_v34  ;;  %v1567_v32 = vadd.f32 %v2214_v35, %v3472_v48  ;;  %v1558_v9 = vpop.f32.mrb[39].mxu0 }
 0x3b6   : > { %1622 = vst [vmem:[%s3478_s9 + $0xa0] sm:$0xff] %v1556_v23  ;;  %v1559_v28 = vadd.f32 %v3472_v48, %v1558_v9 }
 0x3b7   : > { %1625 = vst [vmem:[%s3478_s9 + $0xb8] sm:$0xff] %v1567_v32 }
 0x3b8   : > { %1623 = vst [vmem:[%s3478_s9 + $0xa8] sm:$0xff] %v1559_v28 }
 0x3ba   : > { %v2217_v33 = vpop.f32.mrb[40].mxu0 }
 0x3bb   : > { %v1580_v51 = vadd.f32 %v2217_v33, %v3472_v48  ;;  %v1571_v25 = vpop.f32.mrb[41].mxu0 }
 0x3bc   : > { %v1572_v27 = vadd.f32 %v3472_v48, %v1571_v25  ;;  %v2218_v22 = vpop.f32.mrb[42].mxu0 }
 0x3bd   : > { %1628 = vst [vmem:[%s3478_s9 + $0xd0] sm:$0xff] %v1580_v51  ;;  %v1583_v43 = vadd.f32 %v2218_v22, %v3472_v48  ;;  %v1574_v11 = vpop.f32.mrb[43].mxu0 }
 0x3be   : > { %1626 = vst [vmem:[%s3478_s9 + $0xc0] sm:$0xff] %v1572_v27  ;;  %v1575_v46 = vadd.f32 %v3472_v48, %v1574_v11 }
 0x3bf   : > { %1629 = vst [vmem:[%s3478_s9 + $0xd8] sm:$0xff] %v1583_v43 }
 0x3c0   : > { %1627 = vst [vmem:[%s3478_s9 + $0xc8] sm:$0xff] %v1575_v46 }
 0x3c2   : > { %v2221_v17 = vpop.f32.mrb[44].mxu0 }
 0x3c3   : > { %v1596_v5 = vadd.f32 %v2221_v17, %v3472_v48  ;;  %v1587_v15 = vpop.f32.mrb[45].mxu0 }
 0x3c4   : > { %v1588_v18 = vadd.f32 %v3472_v48, %v1587_v15  ;;  %v2222_v16 = vpop.f32.mrb[46].mxu0 }
 0x3c5   : > { %1632 = vst [vmem:[%s3478_s9 + $0xf0] sm:$0xff] %v1596_v5  ;;  %v1599_v36 = vadd.f32 %v2222_v16, %v3472_v48  ;;  %v1590_v41 = vpop.f32.mrb[47].mxu0 }
 0x3c6   : > { %1630 = vst [vmem:[%s3478_s9 + $0xe0] sm:$0xff] %v1588_v18  ;;  %v1591_v20 = vadd.f32 %v3472_v48, %v1590_v41 }
 0x3c7   : > { %1633 = vst [vmem:[%s3478_s9 + $0xf8] sm:$0xff] %v1599_v36 }
 0x3c8   : > { %1631 = vst [vmem:[%s3478_s9 + $0xe8] sm:$0xff] %v1591_v20 }
 0x3c9   : > { %2558 = shalt.err (!%p2555_p6)
}
 0x3ca   : > { %s2559_s27 = scalar_lea.hbm %s3543_s0, 4096  ;;  %s2563_s30 = scalar_lea.hbm %s3723_s22, 8192 }
 0x3cb   : > { %p2560_p13 = scmp.ne.s32.totalorder %s3543_s0, %s2559_s27  ;;  %p2564_p12 = scmp.lt.u32.totalorder %s3543_s0, %s3723_s22 }
 0x3cc   : > { %p2565_p0 = scmp.lt.u32.totalorder %s2563_s30, %s2559_s27  ;;  %p2567_p3 = scmp.lt.u32.totalorder %s2559_s27, %s3543_s0 }
 0x3cd   : > { %p2561_p4 = pnand %p2560_p13, %p3724_p2 }
 0x3ce   : > { %p2566_p1 = por %p2565_p0, %p2564_p12 }
 0x3cf   : > { %p2562_p9 = pneg %p2561_p4 }
 0x3d0   : > { %p2568_p7 = por %p2567_p3, %p2566_p1 }
 0x3d2   : > { %p2569_p11 = pnand %p2568_p7, %p2562_p9 }
 0x3d4   : > { %2572 = shalt.err (!%p2569_p11)
}
 0x3d5   : > { %s2636_s28 = smov 128   ;;  %s2637_s14 = smov 8  }
 0x3d6   : > { %2257 = dma.vmem_to_hbm [thread:$0]  (%p3724_p2), %s3545_s25, 4096, %s3543_s0, %s1635_s20, %s2636_s28, %s2636_s28, %s2637_s14  }
 0x3d7 PF: > { %s3725_s16 = sld [smem:[#allocation18_spill]]  ;;  %s3726_s15 = sld [smem:[#allocation23_spill]] }
 0x3d8   : > { %p3728_p5 = scmp.ge.s32.totalorder %s2623_s12, 2 }
 0x3dd   : > { %s1663_s9 = sand.u32 1, %s3725_s16   ;;  %p3727_p8 = scmp.ne.s32.totalorder %s3726_s15, 0 }
 0x3de   : > { %s1664_s24 = scalar_lea.sflag [#allocation4], %s1663_s9 }
 0x3df   : > { %p2280_p10 = pnand %p3728_p5, %p3727_p8 }
 0x3e1   : > { %2606 = dma.done.wait (!%p2280_p10), %s1664_s24, 4096  }
 0x3e2   : > { %2608 = vsyncadd (!%p2280_p10), %s1664_s24, 4294963200  ;;  %s3729_s12 = sld [smem:[#allocation20_spill]]  ;;  %s3730_s19 = sld [smem:[#allocation19_spill]] }
 0x3e3   : > { %s3731_s11 = sld [smem:[#allocation21_spill]]  ;;  %s3732_s30 = smov %s2615_s10 }
 0x3e8   : > { %p24_p6 = scmp.ge.s32.totalorder %s3729_s12, 4   ;;  %s3733_s10 = smov %s3730_s19 }
 0x3ea   :  { %26 = sbr.rel (!%p24_p6) target bundleno = 13 (0xd), region = 135 }
 0x3f1   :  { %1669 = vsyncpa [#allocation3], 1 }
 0x3f2   :  { %1671 = vsyncpa [#allocation3 + $0x1], 1 }
 0x3f3   :  { %1672 = vsyncpa [#allocation6], 1 }
 0x3f4   :  { %1673 = vsyncpa [#allocation9], 1 }
 0x3f5   :  { %1674 = vsyncpa [#allocation4], 1 }
 0x3f6   :  { %1676 = vsyncpa [#allocation4 + $0x1], 1 }

</bundles_post_ra>
